<compile_context>
chip_gen: v7x
topology: tpu7x:2x2x1
jax: 0.10.0
libtpu: 0.0.40
codegen_flags: <defaults>
</compile_context>

<pallas_src>
import math
from functools import partial

import jax
import jax.numpy as jnp
from jax.experimental import pallas as pl
from jax.experimental.pallas import tpu as pltpu


# ----------------------------- in-kernel helpers -----------------------------

def _erf(x):
    # Abramowitz & Stegun 7.1.26 (|err| < 1.5e-7): matches torch's exact erf-GELU to f32 precision.
    a1, a2, a3, a4, a5 = 0.254829592, -0.284496736, 1.421413741, -1.453152027, 1.061405429
    p = 0.3275911
    s = jnp.where(x >= 0.0, 1.0, -1.0)
    ax = jnp.abs(x)
    t = 1.0 / (1.0 + p * ax)
    poly = ((((a5 * t + a4) * t + a3) * t + a2) * t + a1) * t
    return s * (1.0 - poly * jnp.exp(-ax * ax))


def _gelu(x):
    return 0.5 * x * (1.0 + _erf(x * (1.0 / math.sqrt(2.0))))


def _layer_norm(h, g, b):
    mu = jnp.mean(h, axis=-1, keepdims=True)
    var = jnp.mean(jnp.square(h - mu), axis=-1, keepdims=True)
    return (h - mu) * jax.lax.rsqrt(var + 1e-5) * g + b


# ------------------------------ fused kernel ----------------------------------

def _fused_encoder_kernel(nhead,
                          src_ref, pw_ref, pb_ref, cls_ref,
                          wqkv_ref, bqkv_ref, wo_ref, bo_ref,
                          ln1g_ref, ln1b_ref,
                          w1_ref, b1_ref, w2_ref, b2_ref,
                          ln2g_ref, ln2b_ref,
                          o_ref, acc_ref):
    l = pl.program_id(1)
    bb, S, F = src_ref.shape
    D = pw_ref.shape[1]
    T = S + 1
    M = acc_ref.shape[0]                 # bb * T_pad
    T_pad = M // bb
    Dh = D // nhead
    scale = 1.0 / math.sqrt(Dh)
    f32 = jnp.float32
    bf16 = jnp.bfloat16

    # ---- phase 0 (first layer step): build the resident activation slab with ONE store ----
    @pl.when(l == 0)
    def _():
        xb = src_ref[...]                                     # (bb, S, F)
        xmin = jnp.min(xb, axis=1, keepdims=True)             # torch: min over dim=1 (seq)
        xmax = jnp.max(xb, axis=1, keepdims=True)
        xn = (xb - xmin) / (xmax - xmin + 1e-6)
        proj = jnp.dot(xn.reshape(bb * S, F), pw_ref[...],    # small, one-shot -> keep f32
                       preferred_element_type=f32) + pb_ref[...]
        pieces = [jnp.broadcast_to(cls_ref[...].reshape(1, 1, D), (bb, 1, D)),
                  proj.reshape(bb, S, D)]
        if T_pad > T:                                         # zero pad rows (keeps P@V NaN-free)
            pieces.append(jnp.zeros((bb, T_pad - T, D), f32))
        acc_ref[...] = jnp.concatenate(pieces, axis=1).reshape(M, D)

    # ---- one post-norm TransformerEncoderLayer on the flattened (M, D) slab ----
    x = acc_ref[...]                                          # (M, D) f32
    x16 = x.astype(bf16)

    qkv = jnp.dot(x16, wqkv_ref[0], preferred_element_type=f32) + bqkv_ref[0]   # (M, 3D) f32
    q = (qkv[:, :D] * scale).astype(bf16)
    k = qkv[:, D:2 * D].astype(bf16)
    v = qkv[:, 2 * D:].astype(bf16)

    # causal mask built in-register (pad columns have col >= T > row, so they are masked too)
    row = jax.lax.broadcasted_iota(jnp.int32, (T_pad, T_pad), 0)
    col = jax.lax.broadcasted_iota(jnp.int32, (T_pad, T_pad), 1)
    mask = jnp.where(col > row, jnp.float32(-1e30), jnp.float32(0.0))           # (T_pad, T_pad)

    # per-HEAD loop only; each head is one batched dot_general over the whole batch block
    ctx_heads = []
    for h in range(nhead):
        qh = q[:, h * Dh:(h + 1) * Dh].reshape(bb, T_pad, Dh)
        kh = k[:, h * Dh:(h + 1) * Dh].reshape(bb, T_pad, Dh)
        vh = v[:, h * Dh:(h + 1) * Dh].reshape(bb, T_pad, Dh)
        s = jnp.einsum("bqd,bkd->bqk", qh, kh, preferred_element_type=f32)      # (bb,T_pad,T_pad)
        s = s + mask[None, :, :]
        s = s - jnp.max(s, axis=-1, keepdims=True)
        p = jnp.exp(s)
        p = p * pl.reciprocal(jnp.sum(p, axis=-1, keepdims=True), approx=True)
        ctx_heads.append(jnp.einsum("bqk,bkd->bqd", p.astype(bf16), vh,
                                    preferred_element_type=f32).reshape(M, Dh))
    ctx = jnp.concatenate(ctx_heads, axis=-1)                                    # (M, D) f32
    attn = jnp.dot(ctx.astype(bf16), wo_ref[0], preferred_element_type=f32) + bo_ref[0]

    # residual + LayerNorm1 (post-norm, eps=1e-5) in f32
    h1 = _layer_norm(x + attn, ln1g_ref[0], ln1b_ref[0])

    # FFN: linear1 -> exact GELU -> linear2 (bf16 matmul inputs, f32 accumulation)
    ff = jnp.dot(h1.astype(bf16), w1_ref[0], preferred_element_type=f32) + b1_ref[0]
    ff = _gelu(ff)
    ff = jnp.dot(ff.astype(bf16), w2_ref[0], preferred_element_type=f32) + b2_ref[0]

    out = _layer_norm(h1 + ff, ln2g_ref[0], ln2b_ref[0])

    last = pl.num_programs(1) - 1

    @pl.when(l < last)
    def _():
        acc_ref[...] = out                                    # carry to next layer step only

    @pl.when(l == last)
    def _():
        o_ref[...] = out.reshape(bb, T_pad, D).astype(o_ref.dtype)   # single aligned writeback


# --------------------------------- wrapper -------------------------------------

def tf_encoder_forward(src, params, nhead, batch_block=None):
    B, S, F = src.shape
    D = params["proj_w"].shape[1]
    Fff = params["w1"].shape[2]
    L = params["wqkv"].shape[0]
    T = S + 1
    T_pad = ((T + 7) // 8) * 8                                # sublane-aligned token count

    # batch block: fill ~256 matmul rows, but keep >=2 "parallel" grid steps (v7x megacore);
    # pad the batch to a multiple of bb instead of degrading the block size for odd batches.
    if batch_block is not None:
        bb = batch_block
    else:
        bb = max(1, min(B, 256 // T_pad))
        if B > 1:
            bb = min(bb, (B + 1) // 2)
    B_pad = ((B + bb - 1) // bb) * bb
    if B_pad != B:
        src = jnp.pad(src, ((0, B_pad - B), (0, 0), (0, 0)))
    NB = B_pad // bb
    M = bb * T_pad

    # explicit VMEM budget: double-buffered per-layer weight slab + embed inputs + IO + scratch
    def _nb(a):
        return int(a.size * a.dtype.itemsize)
    per_layer = sum(_nb(params[k]) // L for k in
                    ("wqkv", "bqkv", "wo", "bo", "ln1_g", "ln1_b",
                     "w1", "b1", "w2", "b2", "ln2_g", "ln2_b"))
    embed = _nb(params["proj_w"]) + _nb(params["proj_b"]) + _nb(params["cls"])
    src_blk = bb * S * F * 4
    io_blk = M * D * 4
    interm = 4 * M * (3 * D + 2 * Fff + 6 * D) + 12 * bb * T_pad * T_pad
    vmem_needed = 2 * (per_layer + embed + src_blk + io_blk) + io_blk + interm
    vmem_limit = int(min(56 * 2 ** 20, max(24 * 2 ** 20, 2 * vmem_needed)))

    const2 = lambda shp: pl.BlockSpec(shp, lambda nb, l: (0, 0))
    layer3 = lambda shp: pl.BlockSpec((1,) + shp, lambda nb, l: (l, 0, 0))

    kernel = partial(_fused_encoder_kernel, nhead)
    out = pl.pallas_call(
        kernel,
        out_shape=jax.ShapeDtypeStruct((B_pad, T_pad, D), jnp.float32),
        grid_spec=pltpu.PrefetchScalarGridSpec(
            num_scalar_prefetch=0,
            grid=(NB, L),
            in_specs=[
                pl.BlockSpec((bb, S, F), lambda nb, l: (nb, 0, 0)),   # src
                const2((F, D)), const2((1, D)), const2((1, D)),       # proj_w, proj_b, cls
                layer3((D, 3 * D)), layer3((1, 3 * D)),               # wqkv, bqkv
                layer3((D, D)), layer3((1, D)),                       # wo, bo
                layer3((1, D)), layer3((1, D)),                       # ln1 gamma/beta
                layer3((D, Fff)), layer3((1, Fff)),                   # w1, b1
                layer3((Fff, D)), layer3((1, D)),                     # w2, b2
                layer3((1, D)), layer3((1, D)),                       # ln2 gamma/beta
            ],
            out_specs=pl.BlockSpec((bb, T_pad, D), lambda nb, l: (nb, 0, 0)),
            scratch_shapes=[pltpu.VMEM((M, D), jnp.float32)],         # resident activation slab
        ),
        compiler_params=pltpu.CompilerParams(
            dimension_semantics=("parallel", "arbitrary"),
            vmem_limit_bytes=vmem_limit),
    )(src, params["proj_w"], params["proj_b"], params["cls"],
      params["wqkv"], params["bqkv"], params["wo"], params["bo"],
      params["ln1_g"], params["ln1_b"],
      params["w1"], params["b1"], params["w2"], params["b2"],
      params["ln2_g"], params["ln2_b"])
    return out[:B, :T, :]


# --------------------------------- params --------------------------------------

def init_params(key, fea_size, d_model, nhead, dim_ff, num_layers):
    keys = jax.random.split(key, 10)

    def nrm(k, shape, dtype=jnp.float32, scale=0.02):
        return (scale * jax.random.normal(k, shape)).astype(dtype)

    L, D, Fff = num_layers, d_model, dim_ff
    bf16 = jnp.bfloat16
    return {
        "cls": jnp.ones((1, D), jnp.float32),            # nn.Parameter(torch.ones(1,1,D))
        "proj_w": nrm(keys[0], (fea_size, D)),           # Linear(fea_size, D), W^T layout
        "proj_b": nrm(keys[1], (1, D)),
        # stacked per-layer weights (leading axis = layer); big matmul weights stored bf16
        "wqkv": nrm(keys[2], (L, D, 3 * D), bf16),       # in_proj_weight^T, columns = q|k|v
        "bqkv": nrm(keys[3], (L, 1, 3 * D)),
        "wo": nrm(keys[4], (L, D, D), bf16),             # out_proj.weight^T
        "bo": nrm(keys[5], (L, 1, D)),
        "ln1_g": jnp.ones((L, 1, D), jnp.float32),
        "ln1_b": jnp.zeros((L, 1, D), jnp.float32),
        "w1": nrm(keys[6], (L, D, Fff), bf16),           # linear1.weight^T
        "b1": nrm(keys[7], (L, 1, Fff)),
        "w2": nrm(keys[8], (L, Fff, D), bf16),           # linear2.weight^T
        "b2": nrm(keys[9], (L, 1, D)),
        "ln2_g": jnp.ones((L, 1, D), jnp.float32),
        "ln2_b": jnp.zeros((L, 1, D), jnp.float32),
    }


# ------------------------------ pure-JAX reference -----------------------------

def _reference(src, params, nhead):
    f32 = jnp.float32
    x = src
    xmin = x.min(axis=1, keepdims=True)
    xmax = x.max(axis=1, keepdims=True)
    x = (x - xmin) / (xmax - xmin + 1e-6)
    D = params["proj_w"].shape[1]
    h = jnp.einsum("bsf,fd->bsd", x, params["proj_w"]) + params["proj_b"]
    cls = jnp.broadcast_to(params["cls"][None], (x.shape[0], 1, D))
    h = jnp.concatenate([cls, h], axis=1)
    B, T, _ = h.shape
    Dh = D // nhead
    mask = jnp.where(jnp.arange(T)[None, :] > jnp.arange(T)[:, None], -1e30, 0.0)
    for l in range(params["wqkv"].shape[0]):
        wqkv = params["wqkv"][l].astype(f32)
        wo = params["wo"][l].astype(f32)
        w1 = params["w1"][l].astype(f32)
        w2 = params["w2"][l].astype(f32)
        qkv = jnp.einsum("btd,de->bte", h, wqkv) + params["bqkv"][l]
        q, k, v = qkv[..., :D], qkv[..., D:2 * D], qkv[..., 2 * D:]
        rs = lambda a: a.reshape(B, T, nhead, Dh).transpose(0, 2, 1, 3)
        q, k, v = rs(q) / math.sqrt(Dh), rs(k), rs(v)
        s = jnp.einsum("bhqd,bhkd->bhqk", q, k) + mask
        p = jax.nn.softmax(s, axis=-1)
        ctx = jnp.einsum("bhqk,bhkd->bhqd", p, v).transpose(0, 2, 1, 3).reshape(B, T, D)
        attn = jnp.einsum("btd,de->bte", ctx, wo) + params["bo"][l]
        h1 = h + attn
        mu = h1.mean(-1, keepdims=True)
        var = ((h1 - mu) ** 2).mean(-1, keepdims=True)
        h1 = (h1 - mu) * jax.lax.rsqrt(var + 1e-5) * params["ln1_g"][l] + params["ln1_b"][l]
        f = jnp.einsum("btd,df->btf", h1, w1) + params["b1"][l]
        f = jax.nn.gelu(f, approximate=False)
        f = jnp.einsum("btf,fd->btd", f, w2) + params["b2"][l]
        h2 = h1 + f
        mu2 = h2.mean(-1, keepdims=True)
        var2 = ((h2 - mu2) ** 2).mean(-1, keepdims=True)
        h = (h2 - mu2) * jax.lax.rsqrt(var2 + 1e-5) * params["ln2_g"][l] + params["ln2_b"][l]
    return h


# ----------------------------------- main ---------------------------------------

if __name__ == "__main__":
    # small shapes consistent with the module: src is (batch, seq_lens, fea_size)
    B, SEQ, FEA = 2, 8, 16
    D_MODEL, NHEAD, DIM_FF, NUM_LAYERS = 32, 4, 64, 2

    key = jax.random.PRNGKey(0)
    k_x, k_p = jax.random.split(key)
    src = jax.random.normal(k_x, (B, SEQ, FEA), dtype=jnp.float32)
    params = init_params(k_p, FEA, D_MODEL, NHEAD, DIM_FF, NUM_LAYERS)

    ref = _reference(src, params, NHEAD)

    # default path: bb chosen so the "parallel" axis has >= 2 steps (v7x megacore)
    out = jax.block_until_ready(tf_encoder_forward(src, params, nhead=NHEAD))
    assert out.shape == (B, SEQ + 1, D_MODEL)
    assert bool(jnp.all(jnp.isfinite(out)))
    assert bool(jnp.allclose(out, ref, rtol=5e-2, atol=5e-2)), "mismatch vs JAX reference (auto bb)"

    # flattened-batch path: whole batch in one (bb*T_pad, D) slab per grid step
    out2 = jax.block_until_ready(tf_encoder_forward(src, params, nhead=NHEAD, batch_block=2))
    assert bool(jnp.allclose(out2, ref, rtol=5e-2, atol=5e-2)), "mismatch vs JAX reference (bb=2)"

    print("KERNEL_OK")
</pallas_src>

<mosaic_0001>
module attributes {stable_mosaic.version = 11 : i64} {
  func.func @_fused_encoder_kernel(%arg0: i32, %arg1: i32, %arg2: memref<1x8x16xf32, #tpu.memory_space<vmem>>, %arg3: memref<16x32xf32, #tpu.memory_space<vmem>>, %arg4: memref<1x32xf32, #tpu.memory_space<vmem>>, %arg5: memref<1x32xf32, #tpu.memory_space<vmem>>, %arg6: memref<1x32x96xbf16, #tpu.memory_space<vmem>>, %arg7: memref<1x1x96xf32, #tpu.memory_space<vmem>>, %arg8: memref<1x32x32xbf16, #tpu.memory_space<vmem>>, %arg9: memref<1x1x32xf32, #tpu.memory_space<vmem>>, %arg10: memref<1x1x32xf32, #tpu.memory_space<vmem>>, %arg11: memref<1x1x32xf32, #tpu.memory_space<vmem>>, %arg12: memref<1x32x64xbf16, #tpu.memory_space<vmem>>, %arg13: memref<1x1x64xf32, #tpu.memory_space<vmem>>, %arg14: memref<1x64x32xbf16, #tpu.memory_space<vmem>>, %arg15: memref<1x1x32xf32, #tpu.memory_space<vmem>>, %arg16: memref<1x1x32xf32, #tpu.memory_space<vmem>>, %arg17: memref<1x1x32xf32, #tpu.memory_space<vmem>>, %arg18: memref<1x16x32xf32, #tpu.memory_space<vmem>>, %arg19: memref<16x32xf32, #tpu.memory_space<vmem>>) attributes {dimension_semantics = [#tpu.dimension_semantics<parallel>, #tpu.dimension_semantics<arbitrary>], iteration_bounds = array<i64: 2, 2>, scalar_prefetch = 0 : i64, scratch_operands = 1 : i64, tpu.core_type = #tpu.core_type<tc>, window_params = [{transform_indices = @transform_0, window_bounds = array<i64: 1, 8, 16>}, {pipeline_mode = #tpu.pipeline_mode<synchronous>, transform_indices = @transform_1, window_bounds = array<i64: 16, 32>}, {pipeline_mode = #tpu.pipeline_mode<synchronous>, transform_indices = @transform_2, window_bounds = array<i64: 1, 32>}, {pipeline_mode = #tpu.pipeline_mode<synchronous>, transform_indices = @transform_3, window_bounds = array<i64: 1, 32>}, {transform_indices = @transform_4, window_bounds = array<i64: 1, 32, 96>}, {transform_indices = @transform_5, window_bounds = array<i64: 1, 1, 96>}, {transform_indices = @transform_6, window_bounds = array<i64: 1, 32, 32>}, {transform_indices = @transform_7, window_bounds = array<i64: 1, 1, 32>}, {transform_indices = @transform_8, window_bounds = array<i64: 1, 1, 32>}, {transform_indices = @transform_9, window_bounds = array<i64: 1, 1, 32>}, {transform_indices = @transform_10, window_bounds = array<i64: 1, 32, 64>}, {transform_indices = @transform_11, window_bounds = array<i64: 1, 1, 64>}, {transform_indices = @transform_12, window_bounds = array<i64: 1, 64, 32>}, {transform_indices = @transform_13, window_bounds = array<i64: 1, 1, 32>}, {transform_indices = @transform_14, window_bounds = array<i64: 1, 1, 32>}, {transform_indices = @transform_15, window_bounds = array<i64: 1, 1, 32>}, {transform_indices = @transform_16, window_bounds = array<i64: 1, 16, 32>}]} {
    %c0_i32 = arith.constant 0 : i32
    %0 = arith.cmpi eq, %arg1, %c0_i32 : i32
    %1 = arith.extui %0 : i1 to i32
    %c0_i32_0 = arith.constant 0 : i32
    %2 = arith.cmpi ne, %1, %c0_i32_0 : i32
    scf.if %2 {
      %c0_89 = arith.constant 0 : index
      %c0_90 = arith.constant 0 : index
      %c0_91 = arith.constant 0 : index
      %240 = vector.load %arg2[%c0_89, %c0_90, %c0_91] : memref<1x8x16xf32, #tpu.memory_space<vmem>>, vector<1x8x16xf32>
      %cst_92 = arith.constant dense<0x7F800000> : vector<1x16xf32>
      %241 = vector.multi_reduction <minimumf>, %240, %cst_92 [1] : vector<1x8x16xf32> to vector<1x16xf32>
      %242 = vector.shape_cast %241 : vector<1x16xf32> to vector<1x1x16xf32>
      %cst_93 = arith.constant dense<0xFF800000> : vector<1x16xf32>
      %243 = vector.multi_reduction <maximumf>, %240, %cst_93 [1] : vector<1x8x16xf32> to vector<1x16xf32>
      %244 = vector.shape_cast %243 : vector<1x16xf32> to vector<1x1x16xf32>
      %245 = vector.broadcast %242 : vector<1x1x16xf32> to vector<1x8x16xf32>
      %246 = arith.subf %240, %245 : vector<1x8x16xf32>
      %247 = arith.subf %244, %242 : vector<1x1x16xf32>
      %cst_94 = arith.constant 9.99999997E-7 : f32
      %248 = vector.broadcast %cst_94 : f32 to vector<1x1x16xf32>
      %249 = arith.addf %247, %248 : vector<1x1x16xf32>
      %250 = vector.broadcast %249 : vector<1x1x16xf32> to vector<1x8x16xf32>
      %251 = arith.divf %246, %250 : vector<1x8x16xf32>
      %252 = vector.shape_cast %251 : vector<1x8x16xf32> to vector<8x16xf32>
      %c0_95 = arith.constant 0 : index
      %c0_96 = arith.constant 0 : index
      %253 = vector.load %arg3[%c0_95, %c0_96] : memref<16x32xf32, #tpu.memory_space<vmem>>, vector<16x32xf32>
      %cst_97 = arith.constant dense<0.000000e+00> : vector<8x32xf32>
      %254 = tpu.matmul %252, %253, %cst_97 {dimension_numbers = #tpu.dot_dimension_numbers<[1], [0], [0], [1], [0, 0, 1, 1], [], []>} : vector<8x16xf32>, vector<16x32xf32>, vector<8x32xf32> -> vector<8x32xf32>
      %c0_98 = arith.constant 0 : index
      %c0_99 = arith.constant 0 : index
      %255 = vector.load %arg4[%c0_98, %c0_99] : memref<1x32xf32, #tpu.memory_space<vmem>>, vector<1x32xf32>
      %256 = vector.broadcast %255 : vector<1x32xf32> to vector<8x32xf32>
      %257 = arith.addf %254, %256 : vector<8x32xf32>
      %c0_100 = arith.constant 0 : index
      %c0_101 = arith.constant 0 : index
      %258 = vector.load %arg5[%c0_100, %c0_101] : memref<1x32xf32, #tpu.memory_space<vmem>>, vector<1x32xf32>
      %259 = vector.shape_cast %258 : vector<1x32xf32> to vector<1x1x32xf32>
      %260 = vector.shape_cast %257 : vector<8x32xf32> to vector<1x8x32xf32>
      %cst_102 = arith.constant 0.000000e+00 : f32
      %261 = vector.broadcast %cst_102 : f32 to vector<1x7x32xf32>
      %262 = tpu.concatenate %259, %260, %261 in 1 : vector<1x1x32xf32>, vector<1x8x32xf32>, vector<1x7x32xf32> -> vector<1x16x32xf32>
      %263 = vector.shape_cast %262 : vector<1x16x32xf32> to vector<16x32xf32>
      %c0_103 = arith.constant 0 : index
      %c0_104 = arith.constant 0 : index
      %264 = vector.load %arg19[%c0_103, %c0_104] : memref<16x32xf32, #tpu.memory_space<vmem>>, vector<16x32xf32>
      tpu.vector_store %arg19[%c0_103, %c0_104], %263 {strides = array<i32>} : memref<16x32xf32, #tpu.memory_space<vmem>>, vector<16x32xf32>,
    } else {
    }
    %c0 = arith.constant 0 : index
    %c0_1 = arith.constant 0 : index
    %3 = vector.load %arg19[%c0, %c0_1] : memref<16x32xf32, #tpu.memory_space<vmem>>, vector<16x32xf32>
    %4 = arith.truncf %3 : vector<16x32xf32> to vector<16x32xbf16>
    %c0_2 = arith.constant 0 : index
    %c0_3 = arith.constant 0 : index
    %c0_4 = arith.constant 0 : index
    %5 = vector.load %arg6[%c0_2, %c0_3, %c0_4] : memref<1x32x96xbf16, #tpu.memory_space<vmem>>, vector<1x32x96xbf16>
    %6 = vector.shape_cast %5 : vector<1x32x96xbf16> to vector<32x96xbf16>
    %cst = arith.constant dense<0.000000e+00> : vector<16x96xf32>
    %7 = tpu.matmul %4, %6, %cst {dimension_numbers = #tpu.dot_dimension_numbers<[1], [0], [0], [1], [0, 0, 1, 1], [], []>} : vector<16x32xbf16>, vector<32x96xbf16>, vector<16x96xf32> -> vector<16x96xf32>
    %c0_5 = arith.constant 0 : index
    %c0_6 = arith.constant 0 : index
    %c0_7 = arith.constant 0 : index
    %8 = vector.load %arg7[%c0_5, %c0_6, %c0_7] : memref<1x1x96xf32, #tpu.memory_space<vmem>>, vector<1x1x96xf32>
    %9 = vector.shape_cast %8 : vector<1x1x96xf32> to vector<1x96xf32>
    %10 = vector.broadcast %9 : vector<1x96xf32> to vector<16x96xf32>
    %11 = arith.addf %7, %10 : vector<16x96xf32>
    %12 = vector.extract_strided_slice %11 {offsets = [0, 0], sizes = [16, 32], strides = [1, 1]} : vector<16x96xf32> to vector<16x32xf32>
    %cst_8 = arith.constant 0.353553385 : f32
    %13 = vector.broadcast %cst_8 : f32 to vector<16x32xf32>
    %14 = arith.mulf %12, %13 : vector<16x32xf32>
    %15 = arith.truncf %14 : vector<16x32xf32> to vector<16x32xbf16>
    %16 = vector.extract_strided_slice %11 {offsets = [0, 32], sizes = [16, 32], strides = [1, 1]} : vector<16x96xf32> to vector<16x32xf32>
    %17 = arith.truncf %16 : vector<16x32xf32> to vector<16x32xbf16>
    %18 = vector.extract_strided_slice %11 {offsets = [0, 64], sizes = [16, 32], strides = [1, 1]} : vector<16x96xf32> to vector<16x32xf32>
    %19 = arith.truncf %18 : vector<16x32xf32> to vector<16x32xbf16>
    %20 = tpu.iota {dimensions = array<i32: 0>} : vector<16x16xi32>
    %21 = tpu.iota {dimensions = array<i32: 1>} : vector<16x16xi32>
    %22 = arith.cmpi sgt, %21, %20 : vector<16x16xi32>
    %cst_9 = arith.constant -1.000000e+30 : f32
    %cst_10 = arith.constant 0.000000e+00 : f32
    %23 = vector.broadcast %cst_9 : f32 to vector<16x16xf32>
    %24 = vector.broadcast %cst_10 : f32 to vector<16x16xf32>
    %25 = arith.select %22, %23, %24 : vector<16x16xi1>, vector<16x16xf32>
    %26 = vector.extract_strided_slice %15 {offsets = [0, 0], sizes = [16, 8], strides = [1, 1]} : vector<16x32xbf16> to vector<16x8xbf16>
    %27 = vector.shape_cast %26 : vector<16x8xbf16> to vector<1x16x8xbf16>
    %28 = vector.extract_strided_slice %17 {offsets = [0, 0], sizes = [16, 8], strides = [1, 1]} : vector<16x32xbf16> to vector<16x8xbf16>
    %29 = vector.shape_cast %28 : vector<16x8xbf16> to vector<1x16x8xbf16>
    %30 = vector.extract_strided_slice %19 {offsets = [0, 0], sizes = [16, 8], strides = [1, 1]} : vector<16x32xbf16> to vector<16x8xbf16>
    %31 = vector.shape_cast %30 : vector<16x8xbf16> to vector<1x16x8xbf16>
    "tpu.trace_start"() <{level = 10 : i32, message = "bqd,bkd->bqk"}> : () -> ()
    %cst_11 = arith.constant dense<0.000000e+00> : vector<1x16x16xf32>
    %32 = tpu.matmul %27, %29, %cst_11 {dimension_numbers = #tpu.dot_dimension_numbers<[2], [2], [1], [1], [0, 0, 0, 1, 1, 1], [0], [0]>} : vector<1x16x8xbf16>, vector<1x16x8xbf16>, vector<1x16x16xf32> -> vector<1x16x16xf32>
    "tpu.trace_stop"() : () -> ()
    %33 = vector.shape_cast %25 : vector<16x16xf32> to vector<1x16x16xf32>
    %34 = arith.addf %32, %33 : vector<1x16x16xf32>
    %cst_12 = arith.constant dense<0xFF800000> : vector<1x16xf32>
    %35 = vector.multi_reduction <maximumf>, %34, %cst_12 [2] : vector<1x16x16xf32> to vector<1x16xf32>
    %36 = vector.shape_cast %35 : vector<1x16xf32> to vector<1x16x1xf32>
    %37 = vector.broadcast %36 : vector<1x16x1xf32> to vector<1x16x16xf32>
    %38 = arith.subf %34, %37 : vector<1x16x16xf32>
    %39 = math.exp %38 : vector<1x16x16xf32>
    %cst_13 = arith.constant dense<0.000000e+00> : vector<1x16xf32>
    %40 = vector.multi_reduction <add>, %39, %cst_13 [2] : vector<1x16x16xf32> to vector<1x16xf32>
    %41 = vector.shape_cast %40 : vector<1x16xf32> to vector<1x16x1xf32>
    %42 = tpu.reciprocal %41 {approx = true} : vector<1x16x1xf32> -> vector<1x16x1xf32>
    %43 = vector.broadcast %42 : vector<1x16x1xf32> to vector<1x16x16xf32>
    %44 = arith.mulf %39, %43 : vector<1x16x16xf32>
    %45 = arith.truncf %44 : vector<1x16x16xf32> to vector<1x16x16xbf16>
    "tpu.trace_start"() <{level = 10 : i32, message = "bqk,bkd->bqd"}> : () -> ()
    %cst_14 = arith.constant dense<0.000000e+00> : vector<1x16x8xf32>
    %46 = tpu.matmul %45, %31, %cst_14 {dimension_numbers = #tpu.dot_dimension_numbers<[2], [1], [1], [2], [0, 0, 0, 1, 1, 2], [0], [0]>} : vector<1x16x16xbf16>, vector<1x16x8xbf16>, vector<1x16x8xf32> -> vector<1x16x8xf32>
    "tpu.trace_stop"() : () -> ()
    %47 = vector.shape_cast %46 : vector<1x16x8xf32> to vector<16x8xf32>
    %48 = vector.extract_strided_slice %15 {offsets = [0, 8], sizes = [16, 8], strides = [1, 1]} : vector<16x32xbf16> to vector<16x8xbf16>
    %49 = vector.shape_cast %48 : vector<16x8xbf16> to vector<1x16x8xbf16>
    %50 = vector.extract_strided_slice %17 {offsets = [0, 8], sizes = [16, 8], strides = [1, 1]} : vector<16x32xbf16> to vector<16x8xbf16>
    %51 = vector.shape_cast %50 : vector<16x8xbf16> to vector<1x16x8xbf16>
    %52 = vector.extract_strided_slice %19 {offsets = [0, 8], sizes = [16, 8], strides = [1, 1]} : vector<16x32xbf16> to vector<16x8xbf16>
    %53 = vector.shape_cast %52 : vector<16x8xbf16> to vector<1x16x8xbf16>
    "tpu.trace_start"() <{level = 10 : i32, message = "bqd,bkd->bqk"}> : () -> ()
    %cst_15 = arith.constant dense<0.000000e+00> : vector<1x16x16xf32>
    %54 = tpu.matmul %49, %51, %cst_15 {dimension_numbers = #tpu.dot_dimension_numbers<[2], [2], [1], [1], [0, 0, 0, 1, 1, 1], [0], [0]>} : vector<1x16x8xbf16>, vector<1x16x8xbf16>, vector<1x16x16xf32> -> vector<1x16x16xf32>
    "tpu.trace_stop"() : () -> ()
    %55 = vector.shape_cast %25 : vector<16x16xf32> to vector<1x16x16xf32>
    %56 = arith.addf %54, %55 : vector<1x16x16xf32>
    %cst_16 = arith.constant dense<0xFF800000> : vector<1x16xf32>
    %57 = vector.multi_reduction <maximumf>, %56, %cst_16 [2] : vector<1x16x16xf32> to vector<1x16xf32>
    %58 = vector.shape_cast %57 : vector<1x16xf32> to vector<1x16x1xf32>
    %59 = vector.broadcast %58 : vector<1x16x1xf32> to vector<1x16x16xf32>
    %60 = arith.subf %56, %59 : vector<1x16x16xf32>
    %61 = math.exp %60 : vector<1x16x16xf32>
    %cst_17 = arith.constant dense<0.000000e+00> : vector<1x16xf32>
    %62 = vector.multi_reduction <add>, %61, %cst_17 [2] : vector<1x16x16xf32> to vector<1x16xf32>
    %63 = vector.shape_cast %62 : vector<1x16xf32> to vector<1x16x1xf32>
    %64 = tpu.reciprocal %63 {approx = true} : vector<1x16x1xf32> -> vector<1x16x1xf32>
    %65 = vector.broadcast %64 : vector<1x16x1xf32> to vector<1x16x16xf32>
    %66 = arith.mulf %61, %65 : vector<1x16x16xf32>
    %67 = arith.truncf %66 : vector<1x16x16xf32> to vector<1x16x16xbf16>
    "tpu.trace_start"() <{level = 10 : i32, message = "bqk,bkd->bqd"}> : () -> ()
    %cst_18 = arith.constant dense<0.000000e+00> : vector<1x16x8xf32>
    %68 = tpu.matmul %67, %53, %cst_18 {dimension_numbers = #tpu.dot_dimension_numbers<[2], [1], [1], [2], [0, 0, 0, 1, 1, 2], [0], [0]>} : vector<1x16x16xbf16>, vector<1x16x8xbf16>, vector<1x16x8xf32> -> vector<1x16x8xf32>
    "tpu.trace_stop"() : () -> ()
    %69 = vector.shape_cast %68 : vector<1x16x8xf32> to vector<16x8xf32>
    %70 = vector.extract_strided_slice %15 {offsets = [0, 16], sizes = [16, 8], strides = [1, 1]} : vector<16x32xbf16> to vector<16x8xbf16>
    %71 = vector.shape_cast %70 : vector<16x8xbf16> to vector<1x16x8xbf16>
    %72 = vector.extract_strided_slice %17 {offsets = [0, 16], sizes = [16, 8], strides = [1, 1]} : vector<16x32xbf16> to vector<16x8xbf16>
    %73 = vector.shape_cast %72 : vector<16x8xbf16> to vector<1x16x8xbf16>
    %74 = vector.extract_strided_slice %19 {offsets = [0, 16], sizes = [16, 8], strides = [1, 1]} : vector<16x32xbf16> to vector<16x8xbf16>
    %75 = vector.shape_cast %74 : vector<16x8xbf16> to vector<1x16x8xbf16>
    "tpu.trace_start"() <{level = 10 : i32, message = "bqd,bkd->bqk"}> : () -> ()
    %cst_19 = arith.constant dense<0.000000e+00> : vector<1x16x16xf32>
    %76 = tpu.matmul %71, %73, %cst_19 {dimension_numbers = #tpu.dot_dimension_numbers<[2], [2], [1], [1], [0, 0, 0, 1, 1, 1], [0], [0]>} : vector<1x16x8xbf16>, vector<1x16x8xbf16>, vector<1x16x16xf32> -> vector<1x16x16xf32>
    "tpu.trace_stop"() : () -> ()
    %77 = vector.shape_cast %25 : vector<16x16xf32> to vector<1x16x16xf32>
    %78 = arith.addf %76, %77 : vector<1x16x16xf32>
    %cst_20 = arith.constant dense<0xFF800000> : vector<1x16xf32>
    %79 = vector.multi_reduction <maximumf>, %78, %cst_20 [2] : vector<1x16x16xf32> to vector<1x16xf32>
    %80 = vector.shape_cast %79 : vector<1x16xf32> to vector<1x16x1xf32>
    %81 = vector.broadcast %80 : vector<1x16x1xf32> to vector<1x16x16xf32>
    %82 = arith.subf %78, %81 : vector<1x16x16xf32>
    %83 = math.exp %82 : vector<1x16x16xf32>
    %cst_21 = arith.constant dense<0.000000e+00> : vector<1x16xf32>
    %84 = vector.multi_reduction <add>, %83, %cst_21 [2] : vector<1x16x16xf32> to vector<1x16xf32>
    %85 = vector.shape_cast %84 : vector<1x16xf32> to vector<1x16x1xf32>
    %86 = tpu.reciprocal %85 {approx = true} : vector<1x16x1xf32> -> vector<1x16x1xf32>
    %87 = vector.broadcast %86 : vector<1x16x1xf32> to vector<1x16x16xf32>
    %88 = arith.mulf %83, %87 : vector<1x16x16xf32>
    %89 = arith.truncf %88 : vector<1x16x16xf32> to vector<1x16x16xbf16>
    "tpu.trace_start"() <{level = 10 : i32, message = "bqk,bkd->bqd"}> : () -> ()
    %cst_22 = arith.constant dense<0.000000e+00> : vector<1x16x8xf32>
    %90 = tpu.matmul %89, %75, %cst_22 {dimension_numbers = #tpu.dot_dimension_numbers<[2], [1], [1], [2], [0, 0, 0, 1, 1, 2], [0], [0]>} : vector<1x16x16xbf16>, vector<1x16x8xbf16>, vector<1x16x8xf32> -> vector<1x16x8xf32>
    "tpu.trace_stop"() : () -> ()
    %91 = vector.shape_cast %90 : vector<1x16x8xf32> to vector<16x8xf32>
    %92 = vector.extract_strided_slice %15 {offsets = [0, 24], sizes = [16, 8], strides = [1, 1]} : vector<16x32xbf16> to vector<16x8xbf16>
    %93 = vector.shape_cast %92 : vector<16x8xbf16> to vector<1x16x8xbf16>
    %94 = vector.extract_strided_slice %17 {offsets = [0, 24], sizes = [16, 8], strides = [1, 1]} : vector<16x32xbf16> to vector<16x8xbf16>
    %95 = vector.shape_cast %94 : vector<16x8xbf16> to vector<1x16x8xbf16>
    %96 = vector.extract_strided_slice %19 {offsets = [0, 24], sizes = [16, 8], strides = [1, 1]} : vector<16x32xbf16> to vector<16x8xbf16>
    %97 = vector.shape_cast %96 : vector<16x8xbf16> to vector<1x16x8xbf16>
    "tpu.trace_start"() <{level = 10 : i32, message = "bqd,bkd->bqk"}> : () -> ()
    %cst_23 = arith.constant dense<0.000000e+00> : vector<1x16x16xf32>
    %98 = tpu.matmul %93, %95, %cst_23 {dimension_numbers = #tpu.dot_dimension_numbers<[2], [2], [1], [1], [0, 0, 0, 1, 1, 1], [0], [0]>} : vector<1x16x8xbf16>, vector<1x16x8xbf16>, vector<1x16x16xf32> -> vector<1x16x16xf32>
    "tpu.trace_stop"() : () -> ()
    %99 = vector.shape_cast %25 : vector<16x16xf32> to vector<1x16x16xf32>
    %100 = arith.addf %98, %99 : vector<1x16x16xf32>
    %cst_24 = arith.constant dense<0xFF800000> : vector<1x16xf32>
    %101 = vector.multi_reduction <maximumf>, %100, %cst_24 [2] : vector<1x16x16xf32> to vector<1x16xf32>
    %102 = vector.shape_cast %101 : vector<1x16xf32> to vector<1x16x1xf32>
    %103 = vector.broadcast %102 : vector<1x16x1xf32> to vector<1x16x16xf32>
    %104 = arith.subf %100, %103 : vector<1x16x16xf32>
    %105 = math.exp %104 : vector<1x16x16xf32>
    %cst_25 = arith.constant dense<0.000000e+00> : vector<1x16xf32>
    %106 = vector.multi_reduction <add>, %105, %cst_25 [2] : vector<1x16x16xf32> to vector<1x16xf32>
    %107 = vector.shape_cast %106 : vector<1x16xf32> to vector<1x16x1xf32>
    %108 = tpu.reciprocal %107 {approx = true} : vector<1x16x1xf32> -> vector<1x16x1xf32>
    %109 = vector.broadcast %108 : vector<1x16x1xf32> to vector<1x16x16xf32>
    %110 = arith.mulf %105, %109 : vector<1x16x16xf32>
    %111 = arith.truncf %110 : vector<1x16x16xf32> to vector<1x16x16xbf16>
    "tpu.trace_start"() <{level = 10 : i32, message = "bqk,bkd->bqd"}> : () -> ()
    %cst_26 = arith.constant dense<0.000000e+00> : vector<1x16x8xf32>
    %112 = tpu.matmul %111, %97, %cst_26 {dimension_numbers = #tpu.dot_dimension_numbers<[2], [1], [1], [2], [0, 0, 0, 1, 1, 2], [0], [0]>} : vector<1x16x16xbf16>, vector<1x16x8xbf16>, vector<1x16x8xf32> -> vector<1x16x8xf32>
    "tpu.trace_stop"() : () -> ()
    %113 = vector.shape_cast %112 : vector<1x16x8xf32> to vector<16x8xf32>
    %114 = tpu.concatenate %47, %69, %91, %113 in 1 : vector<16x8xf32>, vector<16x8xf32>, vector<16x8xf32>, vector<16x8xf32> -> vector<16x32xf32>
    %115 = arith.truncf %114 : vector<16x32xf32> to vector<16x32xbf16>
    %c0_27 = arith.constant 0 : index
    %c0_28 = arith.constant 0 : index
    %c0_29 = arith.constant 0 : index
    %116 = vector.load %arg8[%c0_27, %c0_28, %c0_29] : memref<1x32x32xbf16, #tpu.memory_space<vmem>>, vector<1x32x32xbf16>
    %117 = vector.shape_cast %116 : vector<1x32x32xbf16> to vector<32x32xbf16>
    %cst_30 = arith.constant dense<0.000000e+00> : vector<16x32xf32>
    %118 = tpu.matmul %115, %117, %cst_30 {dimension_numbers = #tpu.dot_dimension_numbers<[1], [0], [0], [1], [0, 0, 1, 1], [], []>} : vector<16x32xbf16>, vector<32x32xbf16>, vector<16x32xf32> -> vector<16x32xf32>
    %c0_31 = arith.constant 0 : index
    %c0_32 = arith.constant 0 : index
    %c0_33 = arith.constant 0 : index
    %119 = vector.load %arg9[%c0_31, %c0_32, %c0_33] : memref<1x1x32xf32, #tpu.memory_space<vmem>>, vector<1x1x32xf32>
    %120 = vector.shape_cast %119 : vector<1x1x32xf32> to vector<1x32xf32>
    %121 = vector.broadcast %120 : vector<1x32xf32> to vector<16x32xf32>
    %122 = arith.addf %118, %121 : vector<16x32xf32>
    %123 = arith.addf %3, %122 : vector<16x32xf32>
    %c0_34 = arith.constant 0 : index
    %c0_35 = arith.constant 0 : index
    %c0_36 = arith.constant 0 : index
    %124 = vector.load %arg10[%c0_34, %c0_35, %c0_36] : memref<1x1x32xf32, #tpu.memory_space<vmem>>, vector<1x1x32xf32>
    %125 = vector.shape_cast %124 : vector<1x1x32xf32> to vector<1x32xf32>
    %c0_37 = arith.constant 0 : index
    %c0_38 = arith.constant 0 : index
    %c0_39 = arith.constant 0 : index
    %126 = vector.load %arg11[%c0_37, %c0_38, %c0_39] : memref<1x1x32xf32, #tpu.memory_space<vmem>>, vector<1x1x32xf32>
    %127 = vector.shape_cast %126 : vector<1x1x32xf32> to vector<1x32xf32>
    %cst_40 = arith.constant dense<0.000000e+00> : vector<16xf32>
    %128 = vector.multi_reduction <add>, %123, %cst_40 [1] : vector<16x32xf32> to vector<16xf32>
    %129 = vector.shape_cast %128 : vector<16xf32> to vector<16x1xf32>
    %cst_41 = arith.constant 3.200000e+01 : f32
    %130 = vector.broadcast %cst_41 : f32 to vector<16x1xf32>
    %131 = arith.divf %129, %130 : vector<16x1xf32>
    %132 = vector.broadcast %131 : vector<16x1xf32> to vector<16x32xf32>
    %133 = arith.subf %123, %132 : vector<16x32xf32>
    %134 = arith.mulf %133, %133 : vector<16x32xf32>
    %cst_42 = arith.constant dense<0.000000e+00> : vector<16xf32>
    %135 = vector.multi_reduction <add>, %134, %cst_42 [1] : vector<16x32xf32> to vector<16xf32>
    %136 = vector.shape_cast %135 : vector<16xf32> to vector<16x1xf32>
    %cst_43 = arith.constant 3.200000e+01 : f32
    %137 = vector.broadcast %cst_43 : f32 to vector<16x1xf32>
    %138 = arith.divf %136, %137 : vector<16x1xf32>
    %139 = vector.broadcast %131 : vector<16x1xf32> to vector<16x32xf32>
    %140 = arith.subf %123, %139 : vector<16x32xf32>
    %cst_44 = arith.constant 9.99999974E-6 : f32
    %141 = vector.broadcast %cst_44 : f32 to vector<16x1xf32>
    %142 = arith.addf %138, %141 : vector<16x1xf32>
    %143 = math.rsqrt %142 : vector<16x1xf32>
    %144 = vector.broadcast %143 : vector<16x1xf32> to vector<16x32xf32>
    %145 = arith.mulf %140, %144 : vector<16x32xf32>
    %146 = vector.broadcast %125 : vector<1x32xf32> to vector<16x32xf32>
    %147 = arith.mulf %145, %146 : vector<16x32xf32>
    %148 = vector.broadcast %127 : vector<1x32xf32> to vector<16x32xf32>
    %149 = arith.addf %147, %148 : vector<16x32xf32>
    %150 = arith.truncf %149 : vector<16x32xf32> to vector<16x32xbf16>
    %c0_45 = arith.constant 0 : index
    %c0_46 = arith.constant 0 : index
    %c0_47 = arith.constant 0 : index
    %151 = vector.load %arg12[%c0_45, %c0_46, %c0_47] : memref<1x32x64xbf16, #tpu.memory_space<vmem>>, vector<1x32x64xbf16>
    %152 = vector.shape_cast %151 : vector<1x32x64xbf16> to vector<32x64xbf16>
    %cst_48 = arith.constant dense<0.000000e+00> : vector<16x64xf32>
    %153 = tpu.matmul %150, %152, %cst_48 {dimension_numbers = #tpu.dot_dimension_numbers<[1], [0], [0], [1], [0, 0, 1, 1], [], []>} : vector<16x32xbf16>, vector<32x64xbf16>, vector<16x64xf32> -> vector<16x64xf32>
    %c0_49 = arith.constant 0 : index
    %c0_50 = arith.constant 0 : index
    %c0_51 = arith.constant 0 : index
    %154 = vector.load %arg13[%c0_49, %c0_50, %c0_51] : memref<1x1x64xf32, #tpu.memory_space<vmem>>, vector<1x1x64xf32>
    %155 = vector.shape_cast %154 : vector<1x1x64xf32> to vector<1x64xf32>
    %156 = vector.broadcast %155 : vector<1x64xf32> to vector<16x64xf32>
    %157 = arith.addf %153, %156 : vector<16x64xf32>
    %cst_52 = arith.constant 5.000000e-01 : f32
    %158 = vector.broadcast %cst_52 : f32 to vector<16x64xf32>
    %159 = arith.mulf %158, %157 : vector<16x64xf32>
    %cst_53 = arith.constant 0.707106769 : f32
    %160 = vector.broadcast %cst_53 : f32 to vector<16x64xf32>
    %161 = arith.mulf %157, %160 : vector<16x64xf32>
    %cst_54 = arith.constant 0.000000e+00 : f32
    %162 = vector.broadcast %cst_54 : f32 to vector<16x64xf32>
    %163 = arith.cmpf oge, %161, %162 : vector<16x64xf32>
    %cst_55 = arith.constant 1.000000e+00 : f32
    %cst_56 = arith.constant -1.000000e+00 : f32
    %164 = vector.broadcast %cst_55 : f32 to vector<16x64xf32>
    %165 = vector.broadcast %cst_56 : f32 to vector<16x64xf32>
    %166 = arith.select %163, %164, %165 : vector<16x64xi1>, vector<16x64xf32>
    %167 = math.absf %161 : vector<16x64xf32>
    %cst_57 = arith.constant 0.327591091 : f32
    %168 = vector.broadcast %cst_57 : f32 to vector<16x64xf32>
    %169 = arith.mulf %168, %167 : vector<16x64xf32>
    %cst_58 = arith.constant 1.000000e+00 : f32
    %170 = vector.broadcast %cst_58 : f32 to vector<16x64xf32>
    %171 = arith.addf %170, %169 : vector<16x64xf32>
    %cst_59 = arith.constant 1.000000e+00 : f32
    %172 = vector.broadcast %cst_59 : f32 to vector<16x64xf32>
    %173 = arith.divf %172, %171 : vector<16x64xf32>
    %cst_60 = arith.constant 1.06140542 : f32
    %174 = vector.broadcast %cst_60 : f32 to vector<16x64xf32>
    %175 = arith.mulf %174, %173 : vector<16x64xf32>
    %cst_61 = arith.constant -1.45315206 : f32
    %176 = vector.broadcast %cst_61 : f32 to vector<16x64xf32>
    %177 = arith.addf %175, %176 : vector<16x64xf32>
    %178 = arith.mulf %177, %173 : vector<16x64xf32>
    %cst_62 = arith.constant 1.42141378 : f32
    %179 = vector.broadcast %cst_62 : f32 to vector<16x64xf32>
    %180 = arith.addf %178, %179 : vector<16x64xf32>
    %181 = arith.mulf %180, %173 : vector<16x64xf32>
    %cst_63 = arith.constant -0.284496725 : f32
    %182 = vector.broadcast %cst_63 : f32 to vector<16x64xf32>
    %183 = arith.addf %181, %182 : vector<16x64xf32>
    %184 = arith.mulf %183, %173 : vector<16x64xf32>
    %cst_64 = arith.constant 0.254829586 : f32
    %185 = vector.broadcast %cst_64 : f32 to vector<16x64xf32>
    %186 = arith.addf %184, %185 : vector<16x64xf32>
    %187 = arith.mulf %186, %173 : vector<16x64xf32>
    %cst_65 = arith.constant 0.000000e+00 : f32
    %188 = vector.broadcast %cst_65 : f32 to vector<16x64xf32>
    %189 = arith.subf %188, %167 : vector<16x64xf32>
    %190 = arith.mulf %189, %167 : vector<16x64xf32>
    %191 = math.exp %190 : vector<16x64xf32>
    %192 = arith.mulf %187, %191 : vector<16x64xf32>
    %cst_66 = arith.constant 1.000000e+00 : f32
    %193 = vector.broadcast %cst_66 : f32 to vector<16x64xf32>
    %194 = arith.subf %193, %192 : vector<16x64xf32>
    %195 = arith.mulf %166, %194 : vector<16x64xf32>
    %cst_67 = arith.constant 1.000000e+00 : f32
    %196 = vector.broadcast %cst_67 : f32 to vector<16x64xf32>
    %197 = arith.addf %196, %195 : vector<16x64xf32>
    %198 = arith.mulf %159, %197 : vector<16x64xf32>
    %199 = arith.truncf %198 : vector<16x64xf32> to vector<16x64xbf16>
    %c0_68 = arith.constant 0 : index
    %c0_69 = arith.constant 0 : index
    %c0_70 = arith.constant 0 : index
    %200 = vector.load %arg14[%c0_68, %c0_69, %c0_70] : memref<1x64x32xbf16, #tpu.memory_space<vmem>>, vector<1x64x32xbf16>
    %201 = vector.shape_cast %200 : vector<1x64x32xbf16> to vector<64x32xbf16>
    %cst_71 = arith.constant dense<0.000000e+00> : vector<16x32xf32>
    %202 = tpu.matmul %199, %201, %cst_71 {dimension_numbers = #tpu.dot_dimension_numbers<[1], [0], [0], [1], [0, 0, 1, 1], [], []>} : vector<16x64xbf16>, vector<64x32xbf16>, vector<16x32xf32> -> vector<16x32xf32>
    %c0_72 = arith.constant 0 : index
    %c0_73 = arith.constant 0 : index
    %c0_74 = arith.constant 0 : index
    %203 = vector.load %arg15[%c0_72, %c0_73, %c0_74] : memref<1x1x32xf32, #tpu.memory_space<vmem>>, vector<1x1x32xf32>
    %204 = vector.shape_cast %203 : vector<1x1x32xf32> to vector<1x32xf32>
    %205 = vector.broadcast %204 : vector<1x32xf32> to vector<16x32xf32>
    %206 = arith.addf %202, %205 : vector<16x32xf32>
    %207 = arith.addf %149, %206 : vector<16x32xf32>
    %c0_75 = arith.constant 0 : index
    %c0_76 = arith.constant 0 : index
    %c0_77 = arith.constant 0 : index
    %208 = vector.load %arg16[%c0_75, %c0_76, %c0_77] : memref<1x1x32xf32, #tpu.memory_space<vmem>>, vector<1x1x32xf32>
    %209 = vector.shape_cast %208 : vector<1x1x32xf32> to vector<1x32xf32>
    %c0_78 = arith.constant 0 : index
    %c0_79 = arith.constant 0 : index
    %c0_80 = arith.constant 0 : index
    %210 = vector.load %arg17[%c0_78, %c0_79, %c0_80] : memref<1x1x32xf32, #tpu.memory_space<vmem>>, vector<1x1x32xf32>
    %211 = vector.shape_cast %210 : vector<1x1x32xf32> to vector<1x32xf32>
    %cst_81 = arith.constant dense<0.000000e+00> : vector<16xf32>
    %212 = vector.multi_reduction <add>, %207, %cst_81 [1] : vector<16x32xf32> to vector<16xf32>
    %213 = vector.shape_cast %212 : vector<16xf32> to vector<16x1xf32>
    %cst_82 = arith.constant 3.200000e+01 : f32
    %214 = vector.broadcast %cst_82 : f32 to vector<16x1xf32>
    %215 = arith.divf %213, %214 : vector<16x1xf32>
    %216 = vector.broadcast %215 : vector<16x1xf32> to vector<16x32xf32>
    %217 = arith.subf %207, %216 : vector<16x32xf32>
    %218 = arith.mulf %217, %217 : vector<16x32xf32>
    %cst_83 = arith.constant dense<0.000000e+00> : vector<16xf32>
    %219 = vector.multi_reduction <add>, %218, %cst_83 [1] : vector<16x32xf32> to vector<16xf32>
    %220 = vector.shape_cast %219 : vector<16xf32> to vector<16x1xf32>
    %cst_84 = arith.constant 3.200000e+01 : f32
    %221 = vector.broadcast %cst_84 : f32 to vector<16x1xf32>
    %222 = arith.divf %220, %221 : vector<16x1xf32>
    %223 = vector.broadcast %215 : vector<16x1xf32> to vector<16x32xf32>
    %224 = arith.subf %207, %223 : vector<16x32xf32>
    %cst_85 = arith.constant 9.99999974E-6 : f32
    %225 = vector.broadcast %cst_85 : f32 to vector<16x1xf32>
    %226 = arith.addf %222, %225 : vector<16x1xf32>
    %227 = math.rsqrt %226 : vector<16x1xf32>
    %228 = vector.broadcast %227 : vector<16x1xf32> to vector<16x32xf32>
    %229 = arith.mulf %224, %228 : vector<16x32xf32>
    %230 = vector.broadcast %209 : vector<1x32xf32> to vector<16x32xf32>
    %231 = arith.mulf %229, %230 : vector<16x32xf32>
    %232 = vector.broadcast %211 : vector<1x32xf32> to vector<16x32xf32>
    %233 = arith.addf %231, %232 : vector<16x32xf32>
    %c1_i32 = arith.constant 1 : i32
    %234 = arith.cmpi slt, %arg1, %c1_i32 : i32
    %235 = arith.extui %234 : i1 to i32
    %c0_i32_86 = arith.constant 0 : i32
    %236 = arith.cmpi ne, %235, %c0_i32_86 : i32
    scf.if %236 {
      %c0_89 = arith.constant 0 : index
      %c0_90 = arith.constant 0 : index
      %240 = vector.load %arg19[%c0_89, %c0_90] : memref<16x32xf32, #tpu.memory_space<vmem>>, vector<16x32xf32>
      tpu.vector_store %arg19[%c0_89, %c0_90], %233 {strides = array<i32>} : memref<16x32xf32, #tpu.memory_space<vmem>>, vector<16x32xf32>,
    } else {
    }
    %c1_i32_87 = arith.constant 1 : i32
    %237 = arith.cmpi eq, %arg1, %c1_i32_87 : i32
    %238 = arith.extui %237 : i1 to i32
    %c0_i32_88 = arith.constant 0 : i32
    %239 = arith.cmpi ne, %238, %c0_i32_88 : i32
    scf.if %239 {
      %240 = vector.shape_cast %233 : vector<16x32xf32> to vector<1x16x32xf32>
      %c0_89 = arith.constant 0 : index
      %c0_90 = arith.constant 0 : index
      %c0_91 = arith.constant 0 : index
      %241 = vector.load %arg18[%c0_89, %c0_90, %c0_91] : memref<1x16x32xf32, #tpu.memory_space<vmem>>, vector<1x16x32xf32>
      tpu.vector_store %arg18[%c0_89, %c0_90, %c0_91], %240 {strides = array<i32>} : memref<1x16x32xf32, #tpu.memory_space<vmem>>, vector<1x16x32xf32>,
    } else {
    }
    return
  }
  func.func @transform_0(%arg0: i32, %arg1: i32) -> (i32, i32, i32) {
    %c0_i32 = arith.constant 0 : i32
    %c0_i32_0 = arith.constant 0 : i32
    %c0_i32_1 = arith.constant 0 : i32
    return %arg0, %c0_i32, %c0_i32_0 : i32, i32, i32
  }
  func.func @transform_1(%arg0: i32, %arg1: i32) -> (i32, i32) {
    %c0_i32 = arith.constant 0 : i32
    %c0_i32_0 = arith.constant 0 : i32
    %c0_i32_1 = arith.constant 0 : i32
    return %c0_i32, %c0_i32_0 : i32, i32
  }
  func.func @transform_2(%arg0: i32, %arg1: i32) -> (i32, i32) {
    %c0_i32 = arith.constant 0 : i32
    %c0_i32_0 = arith.constant 0 : i32
    %c0_i32_1 = arith.constant 0 : i32
    return %c0_i32, %c0_i32_0 : i32, i32
  }
  func.func @transform_3(%arg0: i32, %arg1: i32) -> (i32, i32) {
    %c0_i32 = arith.constant 0 : i32
    %c0_i32_0 = arith.constant 0 : i32
    %c0_i32_1 = arith.constant 0 : i32
    return %c0_i32, %c0_i32_0 : i32, i32
  }
  func.func @transform_4(%arg0: i32, %arg1: i32) -> (i32, i32, i32) {
    %c0_i32 = arith.constant 0 : i32
    %c0_i32_0 = arith.constant 0 : i32
    %c0_i32_1 = arith.constant 0 : i32
    return %arg1, %c0_i32, %c0_i32_0 : i32, i32, i32
  }
  func.func @transform_5(%arg0: i32, %arg1: i32) -> (i32, i32, i32) {
    %c0_i32 = arith.constant 0 : i32
    %c0_i32_0 = arith.constant 0 : i32
    %c0_i32_1 = arith.constant 0 : i32
    return %arg1, %c0_i32, %c0_i32_0 : i32, i32, i32
  }
  func.func @transform_6(%arg0: i32, %arg1: i32) -> (i32, i32, i32) {
    %c0_i32 = arith.constant 0 : i32
    %c0_i32_0 = arith.constant 0 : i32
    %c0_i32_1 = arith.constant 0 : i32
    return %arg1, %c0_i32, %c0_i32_0 : i32, i32, i32
  }
  func.func @transform_7(%arg0: i32, %arg1: i32) -> (i32, i32, i32) {
    %c0_i32 = arith.constant 0 : i32
    %c0_i32_0 = arith.constant 0 : i32
    %c0_i32_1 = arith.constant 0 : i32
    return %arg1, %c0_i32, %c0_i32_0 : i32, i32, i32
  }
  func.func @transform_8(%arg0: i32, %arg1: i32) -> (i32, i32, i32) {
    %c0_i32 = arith.constant 0 : i32
    %c0_i32_0 = arith.constant 0 : i32
    %c0_i32_1 = arith.constant 0 : i32
    return %arg1, %c0_i32, %c0_i32_0 : i32, i32, i32
  }
  func.func @transform_9(%arg0: i32, %arg1: i32) -> (i32, i32, i32) {
    %c0_i32 = arith.constant 0 : i32
    %c0_i32_0 = arith.constant 0 : i32
    %c0_i32_1 = arith.constant 0 : i32
    return %arg1, %c0_i32, %c0_i32_0 : i32, i32, i32
  }
  func.func @transform_10(%arg0: i32, %arg1: i32) -> (i32, i32, i32) {
    %c0_i32 = arith.constant 0 : i32
    %c0_i32_0 = arith.constant 0 : i32
    %c0_i32_1 = arith.constant 0 : i32
    return %arg1, %c0_i32, %c0_i32_0 : i32, i32, i32
  }
  func.func @transform_11(%arg0: i32, %arg1: i32) -> (i32, i32, i32) {
    %c0_i32 = arith.constant 0 : i32
    %c0_i32_0 = arith.constant 0 : i32
    %c0_i32_1 = arith.constant 0 : i32
    return %arg1, %c0_i32, %c0_i32_0 : i32, i32, i32
  }
  func.func @transform_12(%arg0: i32, %arg1: i32) -> (i32, i32, i32) {
    %c0_i32 = arith.constant 0 : i32
    %c0_i32_0 = arith.constant 0 : i32
    %c0_i32_1 = arith.constant 0 : i32
    return %arg1, %c0_i32, %c0_i32_0 : i32, i32, i32
  }
  func.func @transform_13(%arg0: i32, %arg1: i32) -> (i32, i32, i32) {
    %c0_i32 = arith.constant 0 : i32
    %c0_i32_0 = arith.constant 0 : i32
    %c0_i32_1 = arith.constant 0 : i32
    return %arg1, %c0_i32, %c0_i32_0 : i32, i32, i32
  }
  func.func @transform_14(%arg0: i32, %arg1: i32) -> (i32, i32, i32) {
    %c0_i32 = arith.constant 0 : i32
    %c0_i32_0 = arith.constant 0 : i32
    %c0_i32_1 = arith.constant 0 : i32
    return %arg1, %c0_i32, %c0_i32_0 : i32, i32, i32
  }
  func.func @transform_15(%arg0: i32, %arg1: i32) -> (i32, i32, i32) {
    %c0_i32 = arith.constant 0 : i32
    %c0_i32_0 = arith.constant 0 : i32
    %c0_i32_1 = arith.constant 0 : i32
    return %arg1, %c0_i32, %c0_i32_0 : i32, i32, i32
  }
  func.func @transform_16(%arg0: i32, %arg1: i32) -> (i32, i32, i32) {
    %c0_i32 = arith.constant 0 : i32
    %c0_i32_0 = arith.constant 0 : i32
    %c0_i32_1 = arith.constant 0 : i32
    return %arg0, %c0_i32, %c0_i32_0 : i32, i32, i32
  }
}

</mosaic_0001>

<bundles_post_ra>
// kernel: tpu_custom_call.1
= control target key start
LH: loop header
LB: loop body
LE: loop exit
PB: predicated region body
PF: predicated region fallthrough
CT: control target
= control target key end

     0   :  { %s3314_s0 = inlined_call_operand.hbm [shape: f32[2,8,16], index: 0, kind: input, shape index: {}]   ;;  %s3315_s1 = inlined_call_operand.hbm [shape: f32[16,32], index: 1, kind: input, shape index: {}]   ;;  %s3316_s2 = inlined_call_operand.vmem [shape: f32[1,32], index: 2, kind: input, shape index: {}]   ;;  %s3317_s3 = inlined_call_operand.hbm [shape: f32[1,32], index: 3, kind: input, shape index: {}]   ;;  %s3318_s4 = inlined_call_operand.vmem [shape: bf16[2,32,96], index: 4, kind: input, shape index: {}]   ;;  %s3319_s5 = inlined_call_operand.vmem [shape: f32[2,1,96], index: 5, kind: input, shape index: {}]   ;;  %s3320_s6 = inlined_call_operand.vmem [shape: bf16[2,32,32], index: 6, kind: input, shape index: {}]   ;;  %s3321_s7 = inlined_call_operand.vmem [shape: f32[2,1,32], index: 7, kind: input, shape index: {}]   ;;  %s3322_s8 = inlined_call_operand.vmem [shape: f32[2,1,32], index: 8, kind: input, shape index: {}]   ;;  %s3323_s9 = inlined_call_operand.vmem [shape: f32[2,1,32], index: 9, kind: input, shape index: {}]   ;;  %s3324_s10 = inlined_call_operand.vmem [shape: bf16[2,32,64], index: 10, kind: input, shape index: {}]   ;;  %s3325_s11 = inlined_call_operand.vmem [shape: f32[2,1,64], index: 11, kind: input, shape index: {}]   ;;  %s3326_s12 = inlined_call_operand.vmem [shape: bf16[2,64,32], index: 12, kind: input, shape index: {}]   ;;  %s3327_s13 = inlined_call_operand.vmem [shape: f32[2,1,32], index: 13, kind: input, shape index: {}]   ;;  %s3328_s14 = inlined_call_operand.vmem [shape: f32[2,1,32], index: 14, kind: input, shape index: {}]   ;;  %s3329_s15 = inlined_call_operand.vmem [shape: f32[2,1,32], index: 15, kind: input, shape index: {}]   ;;  %s3330_s16 = inlined_call_operand.hbm [shape: f32[2,16,32], index: 16, kind: output, shape index: {}]  }
   0x1   :  { %3351 = sst [smem:[#allocation26_spill]] %s3314_s0 }
   0x2   :  { %3352 = sst [smem:[#allocation27_spill]] %s3315_s1 }
   0x3   :  { %3353 = sst [smem:[#allocation28_spill]] %s3316_s2 }
   0x4   :  { %3354 = sst [smem:[#allocation29_spill]] %s3317_s3 }
   0x5   :  { %3355 = sst [smem:[#allocation30_spill]] %s3318_s4 }
   0x6   :  { %3356 = sst [smem:[#allocation31_spill]] %s3320_s6 }
   0x7   :  { %3357 = sst [smem:[#allocation32_spill]] %s3323_s9 }
   0x8   :  { %3358 = sst [smem:[#allocation33_spill]] %s3324_s10 }
   0x9   :  { %3359 = sst [smem:[#allocation34_spill]] %s3325_s11 }
   0xa   :  { %3360 = sst [smem:[#allocation35_spill]] %s3326_s12 }
   0xb   :  { %3361 = sst [smem:[#allocation36_spill]] %s3327_s13 }
   0xc   :  { %3362 = sst [smem:[#allocation37_spill]] %s3328_s14 }
   0xd   :  { %3363 = sst [smem:[#allocation38_spill]] %s3329_s15 }
   0xe   :  { %3364 = sst [smem:[#allocation39_spill]] %s3330_s16 }
   0xf   :  { %21 = vsyncpa [#allocation4], 0 }
  0x10   :  { %23 = vsyncpa [#allocation4 + $0x1], 0 }
  0x11   :  { %24 = vsyncpa [#allocation7], 0 }
  0x12   :  { %25 = vsyncpa [#allocation5], 0 }
  0x13   :  { %27 = vsyncpa [#allocation5 + $0x1], 0  ;;  %s2796_s21 = smov 0   ;;  %s2798_s22 = smov 0  }
  0x14   :  { %s2800_s23 = smov 0   ;;  %s2802_s24 = smov 0  }
  0x15   :  { %s2804_s25 = smov 0   ;;  %s2806_s26 = smov 0  }
  0x16   :  { %s2808_s27 = smov 0   ;;  %s2810_s28 = smov 0  }
  0x17 LB: > { %3365 = sst [smem:[#allocation13_spill]] %s2654_s21  ;;  %s2104_s29 = sadd.s32 4294967295, %s2682_s28   ;;  %s2682_s28 = sphi %s2810_s28, %s33_s28   ;;  %s2678_s27 = sphi %s2808_s27, %s3427_s27   ;;  %s2674_s26 = sphi %s2806_s26, %s3426_s26   ;;  %s2670_s25 = sphi %s2804_s25, %s3425_s25   ;;  %s2666_s24 = sphi %s2802_s24, %s3424_s24   ;;  %s2662_s23 = sphi %s2800_s23, %s3423_s23   ;;  %s2658_s22 = sphi %s2798_s22, %s3422_s22   ;;  %s2654_s21 = sphi %s2796_s21, %s3421_s21  }
  0x18   : > { %3366 = sst [smem:[#allocation14_spill]] %s2658_s22  ;;  %s2105_s30 = sadd.s32 4294967294, %s2682_s28  }
  0x19   : > { %3367 = sst [smem:[#allocation15_spill]] %s2662_s23  ;;  %p65_p0 = scmp.ne.s32.totalorder %s2658_s22, %s2654_s21 }
  0x1a   : > { %3368 = sst [smem:[#allocation16_spill]] %s2670_s25  ;;  %p2840_p1 = scmp.eq.s32.totalorder %s2104_s29, 0 }
  0x1b   : > { %3369 = sst [smem:[#allocation17_spill]] %s2674_s26  ;;  %p2844_p2 = scmp.eq.s32.totalorder %s2104_s29, 3 }
  0x1c   : > { %3370 = sst [smem:[#allocation18_spill]] %s2678_s27  ;;  %p470_p3 = scmp.eq.s32.totalorder %s2105_s30, 3 }
  0x1d   : > { %3371 = sst [smem:[#allocation19_spill]] %s2682_s28  ;;  %p2850_p4 = por %p2840_p1, %p65_p0 }
  0x1e   : > { %s3372_s0 = scalar_select %p2840_p1, 1, 0 }
  0x1f   : > { %s3373_s17 = scalar_select %p2844_p2, 1, 0 }
  0x20   : > { %s3374_s18 = scalar_select %p2850_p4, 1, 0 }
  0x21   : > { %p2106_p5 = scmp.ge.s32.totalorder %s2682_s28, 1  ;;  %p2855_p6 = por %p470_p3, %p65_p0 }
  0x22   : > { %p477_p7 = scmp.lt.s32.totalorder %s2682_s28, 5  ;;  %s2684_s29 = smov [#allocation6]  }
  0x23   : > { %s3375_s19 = scalar_select %p2855_p6, 1, 0 }
  0x24   : > { %p2860_p8 = pnand %p2106_p5, %p477_p7  ;;  %s489_s21 = sshll.u32 %s2684_s29, 4  ;;  %s490_s21 = int_to_ptr.vmem [resolvable:$true] %s489_s21 }
  0x25   : > { %3376 = sst [smem:[#allocation20_spill]] %s3375_s19  ;;  %s2685_s16 = smov [#allocation8]  }
  0x26   : > { %s3377_s20 = scalar_select %p2860_p8, 1, 0 }
  0x27   : > { %p2309_p9 = pneg %p2860_p8  ;;  %s506_s19 = sshll.u32 %s2685_s16, 4  ;;  %s2872_s19 = int_to_ptr.vmem [resolvable:$true] %s506_s19 }
  0x28   : > { %s3379_s1 = sld [smem:[#allocation27_spill]] }
  0x29   : > { %p2868_p10 = pnand %p2309_p9, %p2840_p1 }
  0x2b   : > { %p2496_p12 = pneg %p2868_p10 }
  0x2e   : > { %s2494_s15 = scalar_lea.hbm %s3379_s1, 256 }
  0x2f   : > { %p2495_p11 = scmp.ne.s32.totalorder %s3379_s1, %s2494_s15  ;;  %p2501_p3 = scmp.lt.u32.totalorder %s2494_s15, %s3379_s1 }
  0x31   : > { %p2497_p13 = pnand %p2496_p12, %p2495_p11 }
  0x33   : > { %p2498_p0 = pneg %p2497_p13 }
  0x35   : > { %p2503_p5 = pnand %p2501_p3, %p2498_p0 }
  0x37   : > { %2506 = shalt.err (!%p2503_p5)
}
  0x38   : > { %s2507_s16 = scalar_lea.vmem %s490_s21, 256  ;;  %p2515_p1 = scmp.lt.s32.totalorder %s490_s21, %s490_s21 }
  0x39   : > { %p2508_p7 = scmp.ne.s32.totalorder %s490_s21, %s2507_s16  ;;  %p2516_p4 = scmp.lt.s32.totalorder %s2507_s16, %s2507_s16 }
  0x3b   : > { %p2510_p9 = pnand %p2508_p7, %p2496_p12  ;;  %p2517_p8 = por %p2516_p4, %p2515_p1 }
  0x3d   : > { %p2511_p6 = pneg %p2510_p9 }
  0x3f   : > { %p2518_p2 = pnand %p2517_p8, %p2511_p6 }
  0x41   : > { %2521 = shalt.err (!%p2518_p2)
}
  0x42   : > { %s2686_s2 = smov 128   ;;  %s2687_s14 = smov 8  }
  0x43   : > { %2312 = dma.hbm_to_vmem [thread:$0]  (!%p2868_p10), %s3379_s1, 256, %s490_s21, [#allocation7], %s2686_s2, %s2686_s2, %s2687_s14  }
  0x44   : > { %s3380_s3 = sld [smem:[#allocation29_spill]] }
  0x4a   : > { %s2522_s29 = scalar_lea.hbm %s3380_s3, 16 }
  0x4b   : > { %p2523_p11 = scmp.ne.s32.totalorder %s3380_s3, %s2522_s29  ;;  %p2529_p4 = scmp.lt.u32.totalorder %s2522_s29, %s3380_s3 }
  0x4d   : > { %p2525_p1 = pnand %p2523_p11, %p2496_p12 }
  0x4f   : > { %p2526_p2 = pneg %p2525_p1 }
  0x51   : > { %p2531_p6 = pnand %p2529_p4, %p2526_p2 }
  0x53   : > { %2534 = shalt.err (!%p2531_p6)
}
  0x54   : > { %s2535_s21 = scalar_lea.vmem %s2872_s19, 16  ;;  %s2542_s10 = scalar_lea.vmem %s2872_s19, 32 }
  0x55   : > { %p2536_p8 = scmp.ne.s32.totalorder %s2872_s19, %s2535_s21  ;;  %p2543_p3 = scmp.lt.s32.totalorder %s2872_s19, %s2872_s19 }
  0x56   : > { %p2544_p5 = scmp.lt.s32.totalorder %s2542_s10, %s2535_s21 }
  0x57   : > { %p2538_p13 = pnand %p2536_p8, %p2496_p12 }
  0x58   : > { %p2545_p7 = por %p2544_p5, %p2543_p3 }
  0x59   : > { %p2539_p0 = pneg %p2538_p13 }
  0x5b   : > { %p2546_p9 = pnand %p2545_p7, %p2539_p0 }
  0x5d   : > { %2549 = shalt.err (!%p2546_p9)
}
  0x5e   : > { %2315 = dma.hbm_to_vmem [thread:$0]  (!%p2868_p10), %s3380_s3, 16, %s2872_s19, [#allocation7]  }
  0x5f   : > { %s42_s2 = sadd.s32 1, %s2674_s26  ;;  %s45_s14 = sadd.s32 1, %s2678_s27 }
  0x60   : > { %p43_p12 = scmp.ge.s32.totalorder %s42_s2, 2  ;;  %s52_s30 = sadd.s32 1, %s2662_s23 }
  0x61   : > { %p59_p11 = scmp.ne.s32.totalorder %s2662_s23, %s2658_s22  ;;  %p60_p1 = scmp.eq.s32.totalorder %s2682_s28, 0 }
  0x62   : > { %s3429_s2 = smov (%p43_p12, %s42_s2), 0  ;;  %s3431_s14 = smov (!%p43_p12, %s45_s14), %s2678_s27 }
  0x63   : > { %3381 = sst [smem:[#allocation21_spill]] %s3429_s2  ;;  %p2931_p2 = por %p60_p1, %p59_p11 }
  0x64   : > { %p3383_p4 = scmp.ne.s32.totalorder %s3373_s17, 0  ;;  %p47_p10 = scmp.ge.s32.totalorder %s3431_s14, 2 }
  0x65   : > { %p2326_p8 = scmp.lt.s32.totalorder %s2682_s28, 4  ;;  %s517_s19 = sand.u32 1, %s2662_s23  }
  0x66   : > { %p2937_p6 = por %p3383_p4, %p59_p11  ;;  %s2111_s15 = sshll.u32 %s2678_s27, 7 }
  0x67   : > { %s3433_s14 = smov (%p47_p10, %s3431_s14), 0  ;;  %s2110_s25 = sshll.u32 %s517_s19, 3 }
  0x68   : > { %s3384_s13 = scalar_select %p2937_p6, 1, 0 }
  0x69   : > { %3386 = sst [smem:[#allocation23_spill]] %s3433_s14  ;;  %s49_s29 = ssub.s32 %s2678_s27, %s3433_s14 }
  0x6a   : > { %3385 = sst [smem:[#allocation22_spill]] %s3384_s13  ;;  %p50_p13 = scmp.eq.s32.totalorder %s49_s29, 0 }
  0x6b   : > { %s3387_s10 = sld [smem:[#allocation26_spill]]  ;;  %s521_s17 = scalar_lea.vmem [#allocation3], %s2110_s25 }
  0x6c   : > { %s528_s11 = sshll.u32 %s521_s17, 4  ;;  %p2955_p0 = pnand %p2326_p8, %p2931_p2  ;;  %s2962_s11 = int_to_ptr.vmem [resolvable:$true] %s528_s11 }
  0x6d   : > { %s2960_s3 = scalar_select %p50_p13, %s2662_s23, %s52_s30  }
  0x6e   : > { %s518_s29 = scalar_lea.sflag [#allocation4], %s517_s19  ;;  %p2552_p5 = pneg %p2955_p0 }
  0x6f   : > { %3389 = sst [smem:[#allocation24_spill]] %s2960_s3 }
  0x71   : > { %s2951_s9 = scalar_lea.hbm %s3387_s10, %s2111_s15  ;;  %s2555_s16 = scalar_lea.hbm %s3387_s10, 256 }
  0x72   : > { %s2550_s15 = scalar_lea.hbm %s2951_s9, 128  ;;  %p2556_p12 = scmp.lt.u32.totalorder %s2951_s9, %s3387_s10 }
  0x73   : > { %p2551_p3 = scmp.ne.s32.totalorder %s2951_s9, %s2550_s15  ;;  %p2557_p11 = scmp.lt.u32.totalorder %s2555_s16, %s2550_s15 }
  0x74   : > { %p2559_p2 = scmp.lt.u32.totalorder %s2550_s15, %s2951_s9 }
  0x75   : > { %p2553_p7 = pnand %p2552_p5, %p2551_p3  ;;  %p2558_p1 = por %p2557_p11, %p2556_p12 }
  0x77   : > { %p2554_p9 = pneg %p2553_p7  ;;  %p2560_p4 = por %p2559_p2, %p2558_p1 }
  0x79   : > { %p2561_p10 = pnand %p2560_p4, %p2554_p9 }
  0x7b   : > { %2564 = shalt.err (!%p2561_p10)
}
  0x7c   : > { %s2565_s30 = scalar_lea.vmem %s2962_s11, 128  ;;  %s2688_s19 = smov [#allocation3]  }
  0x7d   : > { %p2566_p8 = scmp.ne.s32.totalorder %s2962_s11, %s2565_s30  ;;  %s2570_s12 = sshll.u32 %s2688_s19, 4  ;;  %s2571_s12 = int_to_ptr.vmem [resolvable:$false] %s2570_s12 }
  0x7e   : > { %s2572_s25 = scalar_lea.vmem %s2571_s12, 256  ;;  %p2573_p7 = scmp.lt.s32.totalorder %s2962_s11, %s2571_s12 }
  0x7f   : > { %p2568_p13 = pnand %p2566_p8, %p2552_p5  ;;  %p2574_p12 = scmp.lt.s32.totalorder %s2572_s25, %s2565_s30 }
  0x81   : > { %p2569_p3 = pneg %p2568_p13  ;;  %p2575_p11 = por %p2574_p12, %p2573_p7 }
  0x83   : > { %p2576_p1 = pnand %p2575_p11, %p2569_p3 }
  0x85   : > { %2579 = shalt.err (!%p2576_p1)
}
  0x86   : > { %2319 = dma.hbm_to_vmem [thread:$0]  (!%p2955_p0), %s2951_s9, 128, %s2962_s11, %s518_s29  }
  0x87   : > { %p3390_p9 = scmp.ne.s32.totalorder %s3377_s20, 0 }
  0x89   : > { %617 = sbr.rel (%p3390_p9) target bundleno = 3062 (0xbf6), region = 84 }
  0x90   : > { %s2992_s15 = sand.u32 1, %s2658_s22   ;;  %p3392_p5 = scmp.ne.s32.totalorder %s3374_s18, 0 }
  0x91   : > { %3391 = sst [smem:[#allocation25_spill]] %s2992_s15  ;;  %s2113_s16 = sshll.u32 %s2992_s15, 3 }
  0x92   : > { %s620_s21 = scalar_lea.sflag [#allocation4], %s2992_s15  ;;  %s623_s17 = scalar_lea.vmem [#allocation3], %s2113_s16 }
  0x93   : > { %2641 = dma.done.wait (%p3392_p5), %s620_s21, 128  }
  0x94   : > { %2643 = vsyncadd (%p3392_p5), %s620_s21, 4294967168  ;;  %p3393_p2 = scmp.ne.s32.totalorder %s3372_s0, 0 }
  0x96   : > { %2645 = dma.done.wait (%p3393_p2), [#allocation7], 272  }
  0x97   : > { %2647 = vsyncadd (%p3393_p2), [#allocation7], 4294967024  ;;  %s2116_s1 = sshll.u32 %s2992_s15, 4  ;;  %p724_p0 = scmp.lt.s32.totalorder %s2666_s24, 1 }
  0x98   : > { %s3394_s4 = sld [smem:[#allocation30_spill]]  ;;  %s3395_s6 = sld [smem:[#allocation31_spill]] }
  0x99   : > { %s3007_s20 = scalar_select %p724_p0, %s2666_s24, 1 }
  0x9a   : > { %s3399_s14 = sld [smem:[#allocation35_spill]]  ;;  %s3400_s26 = sld [smem:[#allocation36_spill]] }
  0x9b   : > { %s2165_s18 = sshll.u32 %s3007_s20, 4  ;;  %s2168_s28 = sshll.u32 %s3007_s20, 5 }
  0x9c   : > { %s3401_s3 = sld [smem:[#allocation37_spill]]  ;;  %s3402_s30 = sld [smem:[#allocation38_spill]] }
  0x9d   : > { %s3063_s12 = scalar_lea.vmem [#allocation9], %s2116_s1  ;;  %p2125_p4 = scmp.ne.s32.totalorder %s2666_s24, 0 }
  0x9e   : > { %s3017_s19 = scalar_lea.vmem %s3394_s4, %s2165_s18  ;;  %s3022_s16 = scalar_lea.vmem %s3395_s6, %s2165_s18  ;;  %v794_v0 = vld [vmem:[#allocation6] sm:$0xff] (!%p2125_p4)  ;;  %v795_v1 = vld [vmem:[#allocation6 + $0x8] sm:$0xff] (!%p2125_p4)  ;;  %v773_v2 = vld [vmem:[%s623_s17] sm:$0xff] (!%p2125_p4)  ;;  %v2689_v3 = vmov (!%p2125_p4), 0.0|0.0   ;;  %vm2690_vm0 = vmmov (!%p2125_p4), 0   ;;  %v2691_v5 = vmov (!%p2125_p4), 0.0  }
  0x9f   : > { %s3397_s4 = sld [smem:[#allocation33_spill]]  ;;  %s3398_s6 = sld [smem:[#allocation34_spill]]  ;;  %2294 = vmatprep.subr.bf16.mxu0 (!%p2125_p4), %v2689_v3  ;;  %v2295_v4 = vpack.c.bf16 (!%p2125_p4), %v795_v1, %v794_v0  ;;  %2207 = vmatprep.mubr.msk.f32.mxu0 (!%p2125_p4), %vm2690_vm0, %v2691_v5  ;;  %vm774_vm1 = vcmask (!%p2125_p4), 130048   ;;  %v876_v29 = vld [vmem:[#allocation8] sm:$0x1] (!%p2125_p4)  ;;  %vm880_vm2 = vcmask (!%p2125_p4), 1040384  }
  0xa0   : > { %s3049_s13 = scalar_lea.vmem %s3399_s14, %s2168_s28  ;;  %s761_s0 = scalar_lea.vmem %s3400_s26, %s3007_s20  ;;  %v775_v6 = vsel (!%p2125_p4), %vm774_vm1, %v773_v2, inf  ;;  %v782_v7 = vsel (!%p2125_p4), %vm774_vm1, %v773_v2, -inf  ;;  %vm883_vm3 = vcmask (!%p2125_p4), 261120  }
  0xa1   : > { %772 = sbr.rel (%p2125_p4) target bundleno = 408 (0x198), region = 100  ;;  %2296 = vmatpush3.bf16.msra.mxu0 (!%p2125_p4), %v2295_v4  ;;  %v776_v8 = vrot.slane (!%p2125_p4), %v775_v6, 4  ;;  %v783_v9 = vrot.slane (!%p2125_p4), %v782_v7, 4  ;;  %s3403_s26 = sld [smem:[#allocation28_spill]] (!%p2125_p4) }
  0xa2   : > { %s764_s29 = scalar_lea.vmem %s3401_s3, %s3007_s20  ;;  %s767_s15 = scalar_lea.vmem %s3402_s30, %s3007_s20 }
  0xa3   : > { %v777_v10 = vmin.f32 (!%p2125_p4), %v775_v6, %v776_v8  ;;  %v784_v11 = vmax.f32 (!%p2125_p4), %v782_v7, %v783_v9 }
  0xa5   : > { %s3039_s23 = scalar_lea.vmem %s3397_s4, %s2165_s18  ;;  %s753_s22 = scalar_lea.vmem %s3398_s6, %s3007_s20  ;;  %v778_v12 = vrot.slane (!%p2125_p4), %v777_v10, 2  ;;  %v785_v13 = vrot.slane (!%p2125_p4), %v784_v11, 2 }
  0xa7   : > { %v779_v14 = vmin.f32 (!%p2125_p4), %v777_v10, %v778_v12  ;;  %v786_v15 = vmax.f32 (!%p2125_p4), %v784_v11, %v785_v13  ;;  %v2126_v25 = vld [vmem:[%s3403_s26] ss:$0 sm:$0xff] (!%p2125_p4) }
  0xa9   : > { %v780_v16 = vrot.slane %v779_v14, 1  ;;  %v787_v17 = vrot.slane %v786_v15, 1 }
  0xab   : > { %v781_v18 = vmin.f32 %v779_v14, %v780_v16  ;;  %v788_v19 = vmax.f32 %v786_v15, %v787_v17 }
  0xad   : > { %v790_v20 = vsub.f32 %v788_v19, %v781_v18  ;;  %v789_v22 = vsub.f32 %v773_v2, %v781_v18 }
  0xaf   : > { %v791_v21 = vadd.f32 1e-06, %v790_v20 }
  0xb1   : > { %2419 = vrcp.f32 %v791_v21 }
  0xbb   : > { %v2420_v23 = vpop.eup %2419 }
  0xbc   : > { %v793_v24 = vmul.f32 %v2420_v23, %v789_v22 }
  0xbe   : > { %2208 = vmatmul.mubr.msk.f32.vlgmr.msra.gmra.mrb[0].mxu0 %vm774_vm1, %v793_v24 }
 0x191   : > { %v872_v26 = vpop.f32.mrb[0].mxu0 }
 0x192   : > { %v873_v27 = vadd.f32 %v2126_v25, %v872_v26  ;;  %v2209_v28 = vpop.f32.mrb[1].mxu0 }
 0x194   : > { %v878_v30 = vrot.slane %v873_v27, 7 }
 0x196   : > { %v881_v31 = vsel %vm880_vm2, %v876_v29, %v878_v30  ;;  %v882_v32 = vsel %vm880_vm2, %v878_v30, 0.0 }
 0x197   : > { %884 = vst.msk [vmem:[#allocation2] sm:$0xff] %vm883_vm3, %v881_v31  ;;  %885 = vst.msk [vmem:[#allocation2 + $0x8] sm:$0xff] %vm883_vm3, %v882_v32 }
 0x198 PF: > { %v2436_v33 = vld [vmem:[%s3017_s19] sm:$0xff]   ;;  %v2692_v34 = vmov 0.0   ;;  %v2437_v35 = vld [vmem:[%s3017_s19 + $0x8] sm:$0xff]   ;;  %vm2693_vm4 = vmmov 0   ;;  %vm912_vm5 = vcmask 261120   ;;  %s3404_s17 = scalar_lea.vmem %s3319_s5, %s3007_s20  ;;  %s2694_s1 = smov 96   ;;  %v961_v61 = vlaneseq }
 0x199   : > { %2210 = vmatprep.subr.bf16.mxu0 %v2692_v34  ;;  %2218 = vmatprep.subr.bf16.mxu1 %v2692_v34  ;;  %v2128_v39 = vld [vmem:[%s3404_s17] ss:$0 sm:$0xff]  ;;  %s2695_s19 = smov 120   ;;  %s2696_s25 = smov 88   ;;  %vm973_vm6 = vcmask 64512   ;;  %vm1021_vm9 = vcmask 130048  }
 0x19a   : > { %2211 = vmatpush3.bf16.msra.mxu0 %v2436_v33  ;;  %2214 = vmatprep.mubr.msk.bf16.mxu0 %vm2693_vm4, %v2692_v34  ;;  %s2697_s10 = smov 80   ;;  %s2698_s21 = smov 112   ;;  %v962_v62 = vshrl.u32 %v961_v61, 7  ;;  %v965_v63 = vand.u32 127, %v961_v61  ;;  %vm1484_vm10 = vcmask 195584   ;;  %vm1764_vm13 = vcmask 523264  }
 0x19b   : > { %2212 = vmatprep.subr.bf16.mxu0 %v2692_v34  ;;  %2220 = vmatprep.mubr.msk.bf16.mxu1 %vm2693_vm4, %v2692_v34  ;;  %s2699_s27 = smov 72   ;;  %s2700_s2 = smov 104  }
 0x19c   : > { %v963_v0 = vadd.s32 8, %v962_v62  ;;  %vm966_vm7 = vcmp.gt.s32.totalorder %v965_v63, %v962_v62  ;;  %s2701_s11 = smov 56   ;;  %s2702_s9 = smov 64  }
 0x19d   : > { %v968_v1 = vsel %vm966_vm7, -1e+30, %v2692_v34  ;;  %s2703_s4 = smov 48   ;;  %s2704_s18 = smov 40  }
 0x19e   : > { %v3078_v36 = vld [vmem:[#allocation2] sm:$0xff]  ;;  %v3080_v37 = vld [vmem:[#allocation2 + $0x8] sm:$0xff]  ;;  %2213 = vmatpush3.bf16.msra.mxu0 %v2437_v35  ;;  %vm967_vm8 = vcmp.gt.s32.totalorder %v965_v63, %v963_v0  ;;  %s2705_s30 = smov 8   ;;  %s2706_s3 = smov 16  }
 0x19f   : > { %v888_v38 = vpack.c.bf16 %v3080_v37, %v3078_v36  ;;  %2224 = vmatprep.subr.bf16.mxu0 %v2692_v34  ;;  %v969_v3 = vsel %vm967_vm8, -1e+30, %v2692_v34  ;;  %s2707_s6 = smov 24   ;;  %s3405_s28 = scalar_lea.vmem %s3321_s7, %s3007_s20 }
 0x1a0   : > { %p2158_p10 = scmp.ge.s32.totalorder %s2666_s24, 1 }
 0x1a1   : > { %2215 = vmatmul.mubr.msk.bf16.vlgmr.msra.gmra.mrb[0].mxu0 %vm912_vm5, %v888_v38 }
 0x1a2   : > { %2226 = vmatprep.mubr.msk.bf16.mxu0 %vm2693_vm4, %v2692_v34 }
 0x274   : > { %v950_v40 = vpop.f32.mrb[0].mxu0 }
 0x275   : > { %v951_v41 = vadd.f32 %v2128_v39, %v950_v40  ;;  %v2216_v42 = vpop.f32.mrb[1].mxu0 }
 0x276   : > { %v953_v43 = vpop.f32.mrb[2].mxu0 }
 0x277   : > { %v954_v44 = vadd.f32 %v2128_v39, %v953_v43  ;;  %v2217_v45 = vpop.f32.mrb[3].mxu0  ;;  %v957_v46 = vmul.f32 0.35355338, %v951_v41 }
 0x279   : > { %v958_v47 = vmul.f32 0.35355338, %v954_v44  ;;  %v3096_v48 = vpack.c.bf16 %v954_v44, %v951_v41 }
 0x27b   : > { %v959_v49 = vpack.c.bf16 %v958_v47, %v957_v46  ;;  %971 = vrot.lane.b32.xlu0 %v3096_v48, %s2694_s1 }
 0x27d   : > { %1093 = vrot.lane.b32.xlu1 %v959_v49, %s2695_s19 }
 0x27f   : > { %1095 = vrot.lane.b32.xlu0 %v3096_v48, %s2696_s25  ;;  %s3407_s25 = sld [smem:[#allocation32_spill]] }
 0x281   : > { %1216 = vrot.lane.b32.xlu1 %v3096_v48, %s2697_s10 }
 0x283   : > { %1214 = vrot.lane.b32.xlu0 %v959_v49, %s2698_s21 }
 0x285   : > { %1337 = vrot.lane.b32.xlu1 %v3096_v48, %s2699_s27  ;;  %s3408_s10 = scalar_lea.vmem %s3407_s25, %s3007_s20 }
 0x287   : > { %1335 = vrot.lane.b32.xlu0 %v959_v49, %s2700_s2 }
 0x2ed   : > { %v972_v50 = vpop.permute.xlu0 %971 }
 0x2ee   : > { %v978_v51 = vsel %vm973_vm6, %v972_v50, 0 }
 0x2ef   : > { %2219 = vmatpush3.bf16.xpose.msra.mxu1 %v978_v51  ;;  %v1094_v53 = vpop.permute.xlu1 %1093 }
 0x2f0   : > { %2230 = vmatprep.subr.bf16.mxu1 %v2692_v34 }
 0x2f1   : > { %v1096_v52 = vpop.permute.xlu0 %1095 }
 0x2f2   : > { %v1101_v54 = vsel %vm973_vm6, %v1096_v52, 0 }
 0x2f3   : > { %v1217_v55 = vpop.permute.xlu1 %1216 }
 0x2f4   : > { %v1222_v56 = vsel %vm973_vm6, %v1217_v55, 0 }
 0x2f5   : > { %v1215_v58 = vpop.permute.xlu0 %1214 }
 0x2f6   : > { %2221 = vmatmul.mubr.msk.bf16.vlgmr.msra.gmra.mrb[0].mxu1 %vm973_vm6, %v959_v49 }
 0x2f7   : > { %2231 = vmatpush3.bf16.xpose.msra.mxu1 %v1101_v54  ;;  %2232 = vmatprep.mubr.msk.bf16.mxu1 %vm2693_vm4, %v2692_v34  ;;  %v1338_v57 = vpop.permute.xlu1 %1337 }
 0x2f8   : > { %2242 = vmatprep.subr.bf16.mxu1 %v2692_v34  ;;  %v1343_v59 = vsel %vm973_vm6, %v1338_v57, 0 }
 0x2f9   : > { %v1336_v60 = vpop.permute.xlu0 %1335 }
 0x2fe   : > { %2233 = vmatmul.mubr.msk.bf16.vlgmr.msra.gmra.mrb[4].mxu1 %vm973_vm6, %v1094_v53 }
 0x2ff   : > { %2243 = vmatpush3.bf16.xpose.msra.mxu1 %v1222_v56  ;;  %2244 = vmatprep.mubr.msk.bf16.mxu1 %vm2693_vm4, %v2692_v34 }
 0x300   : > { %2254 = vmatprep.subr.bf16.mxu1 %v2692_v34 }
 0x306   : > { %2245 = vmatmul.mubr.msk.bf16.vlgmr.msra.gmra.mrb[8].mxu1 %vm973_vm6, %v1215_v58 }
 0x307   : > { %2255 = vmatpush3.bf16.xpose.msra.mxu1 %v1343_v59  ;;  %2256 = vmatprep.mubr.msk.bf16.mxu1 %vm2693_vm4, %v2692_v34 }
 0x308   : > { %2266 = vmatprep.subr.bf16.mxu1 %v2692_v34 }
 0x30e   : > { %2257 = vmatmul.mubr.msk.bf16.vlgmr.msra.gmra.mrb[12].mxu1 %vm973_vm6, %v1336_v60 }
 0x30f   : > { %2270 = vmatprep.mubr.msk.bf16.mxu1 %vm2693_vm4, %v2692_v34 }
 0x3c9   : > { %v1014_v2 = vpop.f32.mrb[0].mxu1 }
 0x3ca   : > { %v1015_v4 = vadd.f32 %v1014_v2, %v968_v1  ;;  %v2222_v5 = vpop.f32.mrb[1].mxu1 }
 0x3cb   : > { %v1017_v6 = vpop.f32.mrb[2].mxu1 }
 0x3cc   : > { %v1018_v7 = vadd.f32 %v1017_v6, %v969_v3  ;;  %v2223_v8 = vpop.f32.mrb[3].mxu1  ;;  %v1022_v9 = vsel %vm1021_vm9, %v1015_v4, -inf }
 0x3cd   : > { %1023 = vmax.xlane.f32.xlu1 %v1022_v9 }
 0x3ce   : > { %v1025_v10 = vsel %vm1021_vm9, %v1018_v7, -inf }
 0x3cf   : > { %1026 = vmax.xlane.f32.xlu0 %v1025_v10 }
 0x3d1   : > { %v1137_v11 = vpop.f32.mrb[4].mxu1 }
 0x3d2   : > { %v1138_v12 = vadd.f32 %v1137_v11, %v968_v1  ;;  %v2234_v13 = vpop.f32.mrb[5].mxu1 }
 0x3d3   : > { %v1140_v14 = vpop.f32.mrb[6].mxu1 }
 0x3d4   : > { %v1141_v15 = vadd.f32 %v1140_v14, %v969_v3  ;;  %v2235_v16 = vpop.f32.mrb[7].mxu1  ;;  %v1144_v17 = vsel %vm1021_vm9, %v1138_v12, -inf }
 0x3d5   : > { %1145 = vmax.xlane.f32.xlu0 %v1144_v17 }
 0x3d6   : > { %v1147_v18 = vsel %vm1021_vm9, %v1141_v15, -inf }
 0x3d7   : > { %1148 = vmax.xlane.f32.xlu1 %v1147_v18 }
 0x3d9   : > { %v1258_v19 = vpop.f32.mrb[8].mxu1 }
 0x3da   : > { %v1259_v20 = vadd.f32 %v1258_v19, %v968_v1  ;;  %v2246_v21 = vpop.f32.mrb[9].mxu1 }
 0x3db   : > { %v1261_v22 = vpop.f32.mrb[10].mxu1 }
 0x3dc   : > { %v1262_v23 = vadd.f32 %v1261_v22, %v969_v3  ;;  %v2247_v24 = vpop.f32.mrb[11].mxu1  ;;  %v1265_v25 = vsel %vm1021_vm9, %v1259_v20, -inf }
 0x3dd   : > { %1266 = vmax.xlane.f32.xlu0 %v1265_v25 }
 0x3de   : > { %v1268_v26 = vsel %vm1021_vm9, %v1262_v23, -inf }
 0x3df   : > { %1269 = vmax.xlane.f32.xlu1 %v1268_v26 }
 0x3e1   : > { %v1379_v27 = vpop.f32.mrb[12].mxu1 }
 0x3e2   : > { %v1380_v28 = vadd.f32 %v1379_v27, %v968_v1  ;;  %v2258_v29 = vpop.f32.mrb[13].mxu1 }
 0x3e3   : > { %v1382_v30 = vpop.f32.mrb[14].mxu1 }
 0x3e4   : > { %v1383_v31 = vadd.f32 %v1382_v30, %v969_v3  ;;  %v2259_v32 = vpop.f32.mrb[15].mxu1  ;;  %v1386_v33 = vsel %vm1021_vm9, %v1380_v28, -inf }
 0x3e5   : > { %1387 = vmax.xlane.f32.xlu0 %v1386_v33 }
 0x3e6   : > { %v1389_v35 = vsel %vm1021_vm9, %v1383_v31, -inf }
 0x3e7   : > { %1390 = vmax.xlane.f32.xlu1 %v1389_v35 }
 0x45a   : > { %v1024_v38 = vpop.xlane.xlu1 %1023 }
 0x45b   : > { %v1028_v39 = vsub.f32 %v1015_v4, %v1024_v38 }
 0x45c   : > { %v1027_v40 = vpop.xlane.xlu0 %1026 }
 0x45d   : > { %v1030_v41 = vmul.f32 1.442695, %v1028_v39  ;;  %v1029_v42 = vsub.f32 %v1018_v7, %v1027_v40 }
 0x45f   : > { %2446 = vpow2.f32 %v1030_v41  ;;  %v1032_v43 = vmul.f32 1.442695, %v1029_v42 }
 0x461   : > { %2448 = vpow2.f32 %v1032_v43 }
 0x462   : > { %v1146_v44 = vpop.xlane.xlu0 %1145 }
 0x463   : > { %v1150_v45 = vsub.f32 %v1138_v12, %v1146_v44 }
 0x464   : > { %v1149_v54 = vpop.xlane.xlu1 %1148 }
 0x465   : > { %v1152_v46 = vmul.f32 1.442695, %v1150_v45  ;;  %v1151_v55 = vsub.f32 %v1141_v15, %v1149_v54 }
 0x467   : > { %2450 = vpow2.f32 %v1152_v46  ;;  %v1154_v58 = vmul.f32 1.442695, %v1151_v55 }
 0x469   : > { %v2447_v47 = vpop.eup %2446  ;;  %2452 = vpow2.f32 %v1154_v58 }
 0x46a   : > { %v1034_v49 = vsel %vm1021_vm9, %v2447_v47, 0.0  ;;  %v1267_v57 = vpop.xlane.xlu0 %1266 }
 0x46b   : > { %v2449_v50 = vpop.eup %2448  ;;  %1035 = vadd.xlane.f32.xlu0 %v1034_v49  ;;  %v1271_v61 = vsub.f32 %v1259_v20, %v1267_v57  ;;  %v2438_v57 = vld [vmem:[%s3022_s16] sm:$0xff]  }
 0x46c   : > { %v1037_v51 = vsel %vm1021_vm9, %v2449_v50, 0.0  ;;  %v1270_v56 = vpop.xlane.xlu1 %1269  ;;  %2267 = vmatpush3.bf16.msra.mxu1 %v2438_v57 }
 0x46d   : > { %1038 = vadd.xlane.f32.xlu1 %v1037_v51  ;;  %v1272_v59 = vsub.f32 %v1262_v23, %v1270_v56  ;;  %v1273_v1 = vmul.f32 1.442695, %v1271_v61  ;;  %2268 = vmatprep.subr.bf16.mxu1 %v2692_v34 }
 0x46f   : > { %v1275_v63 = vmul.f32 1.442695, %v1272_v59 }
 0x471   : > { %v3134_v52 = vpop.eup %2450  ;;  %2454 = vpow2.f32 %v1275_v63 }
 0x472   : > { %v1156_v53 = vsel %vm1021_vm9, %v3134_v52, 0.0  ;;  %v1388_v62 = vpop.xlane.xlu0 %1387  ;;  %2456 = vpow2.f32 %v1273_v1 }
 0x473   : > { %1157 = vadd.xlane.f32.xlu0 %v1156_v53  ;;  %v1392_v2 = vsub.f32 %v1380_v28, %v1388_v62  ;;  %v2453_v5 = vpop.eup %2452  ;;  %v2439_v62 = vld [vmem:[%s3022_s16 + $0x8] sm:$0xff]  }
 0x474   : > { %v1391_v60 = vpop.xlane.xlu1 %1390  ;;  %v1159_v6 = vsel %vm1021_vm9, %v2453_v5, 0.0  ;;  %2269 = vmatpush3.bf16.msra.mxu1 %v2439_v62 }
 0x475   : > { %v1393_v0 = vsub.f32 %v1383_v31, %v1391_v60  ;;  %v1394_v4 = vmul.f32 1.442695, %v1392_v2  ;;  %2282 = vmatprep.subr.bf16.mxu1 %v2692_v34 }
 0x477   : > { %v1396_v3 = vmul.f32 1.442695, %v1393_v0 }
 0x479   : > { %2458 = vpow2.f32 %v1396_v3 }
 0x47a   : > { %2460 = vpow2.f32 %v1394_v4 }
 0x47b   : > { %v2455_v7 = vpop.eup %2454 }
 0x47c   : > { %v2457_v8 = vpop.eup %2456  ;;  %v1280_v9 = vsel %vm1021_vm9, %v2455_v7, 0.0 }
 0x47d   : > { %v1277_v11 = vsel %vm1021_vm9, %v2457_v8, 0.0 }
 0x47e   : > { %1167 = vrot.lane.b32.xlu1 %v3096_v48, %s2701_s11 }
 0x483   : > { %v3142_v10 = vpop.eup %2458 }
 0x484   : > { %v2461_v12 = vpop.eup %2460  ;;  %v1401_v13 = vsel %vm1021_vm9, %v3142_v10, 0.0 }
 0x485   : > { %v1398_v14 = vsel %vm1021_vm9, %v2461_v12, 0.0 }
 0x489   : > { %1045 = vrot.lane.b32.xlu0 %v3096_v48, %s2702_s9 }
 0x4a2   : > { %1160 = vadd.xlane.f32.xlu1 %v1159_v6 }
 0x4a6   : > { %1281 = vadd.xlane.f32.xlu1 %v1280_v9 }
 0x4a8   : > { %1278 = vadd.xlane.f32.xlu0 %v1277_v11 }
 0x4aa   : > { %1402 = vadd.xlane.f32.xlu1 %v1401_v13 }
 0x4ac   : > { %1399 = vadd.xlane.f32.xlu0 %v1398_v14 }
 0x4bb   : > { %1288 = vrot.lane.b32.xlu1 %v3096_v48, %s2703_s4 }
 0x4c2   : > { %1409 = vrot.lane.b32.xlu0 %v3096_v48, %s2704_s18 }
 0x4f8   : > { %v1036_v15 = vpop.xlane.xlu0 %1035 }
 0x4f9   : > { %2462 = vrcp.f32 %v1036_v15 }
 0x4fa   : > { %v1039_v16 = vpop.xlane.xlu1 %1038 }
 0x4fb   : > { %2464 = vrcp.f32 %v1039_v16 }
 0x4fe   : > { %v1168_v24 = vpop.permute.xlu1 %1167 }
 0x500   : > { %v1158_v17 = vpop.xlane.xlu0 %1157 }
 0x501   : > { %2466 = vrcp.f32 %v1158_v17 }
 0x503   : > { %v2463_v18 = vpop.eup %2462 }
 0x504   : > { %v1046_v19 = vpop.permute.xlu0 %1045  ;;  %v1042_v21 = vmul.f32 %v2463_v18, %v2447_v47 }
 0x505   : > { %v2465_v20 = vpop.eup %2464  ;;  %2225 = vmatpush3.bf16.msra.mxu0 %v1046_v19 }
 0x506   : > { %v1043_v22 = vmul.f32 %v2465_v20, %v2449_v50  ;;  %2236 = vmatprep.subr.bf16.mxu0 %v2692_v34 }
 0x508   : > { %v1044_v23 = vpack.c.bf16 %v1043_v22, %v1042_v21 }
 0x50a   : > { %2227 = vmatmul.mubr.msk.bf16.vlgmr.msra.gmra.mrb[4].mxu0 %vm1021_vm9, %v1044_v23  ;;  %v2140_v23 = vld [vmem:[%s3405_s28] ss:$0 sm:$0xff] }
 0x50b   : > { %2237 = vmatpush3.bf16.msra.mxu0 %v1168_v24  ;;  %2238 = vmatprep.mubr.msk.bf16.mxu0 %vm2693_vm4, %v2692_v34  ;;  %v2467_v27 = vpop.eup %2466 }
 0x50c   : > { %2248 = vmatprep.subr.bf16.mxu0 %v2692_v34  ;;  %v1164_v31 = vmul.f32 %v2467_v27, %v3134_v52 }
 0x52f   : > { %v1161_v48 = vpop.xlane.xlu1 %1160 }
 0x530   : > { %2468 = vrcp.f32 %v1161_v48 }
 0x533   : > { %v1282_v25 = vpop.xlane.xlu1 %1281 }
 0x534   : > { %2470 = vrcp.f32 %v1282_v25 }
 0x535   : > { %v1279_v26 = vpop.xlane.xlu0 %1278 }
 0x536   : > { %2472 = vrcp.f32 %v1279_v26 }
 0x537   : > { %v1403_v28 = vpop.xlane.xlu1 %1402 }
 0x539   : > { %v1400_v29 = vpop.xlane.xlu0 %1399 }
 0x53a   : > { %v2469_v30 = vpop.eup %2468  ;;  %2474 = vrcp.f32 %v1400_v29 }
 0x53b   : > { %v1165_v32 = vmul.f32 %v2469_v30, %v2453_v5  ;;  %2476 = vrcp.f32 %v1403_v28  ;;  %v1289_v38 = vpop.permute.xlu1 %1288 }
 0x53d   : > { %v1166_v33 = vpack.c.bf16 %v1165_v32, %v1164_v31  ;;  %v1410_v44 = vpop.permute.xlu0 %1409 }
 0x53e   : > { %v2471_v35 = vpop.eup %2470 }
 0x53f   : > { %2239 = vmatmul.mubr.msk.bf16.vlgmr.msra.gmra.mrb[8].mxu0 %vm1021_vm9, %v1166_v33  ;;  %v1286_v41 = vmul.f32 %v2471_v35, %v2455_v7 }
 0x540   : > { %v2473_v39 = vpop.eup %2472  ;;  %2249 = vmatpush3.bf16.msra.mxu0 %v1289_v38  ;;  %2250 = vmatprep.mubr.msk.bf16.mxu0 %vm2693_vm4, %v2692_v34 }
 0x541   : > { %v1285_v40 = vmul.f32 %v2473_v39, %v2457_v8  ;;  %2260 = vmatprep.subr.bf16.mxu0 %v2692_v34 }
 0x543   : > { %v1287_v42 = vpack.c.bf16 %v1286_v41, %v1285_v40 }
 0x544   : > { %v2475_v43 = vpop.eup %2474 }
 0x545   : > { %v2477_v45 = vpop.eup %2476  ;;  %v1406_v46 = vmul.f32 %v2475_v43, %v2461_v12 }
 0x546   : > { %v1407_v47 = vmul.f32 %v2477_v45, %v3142_v10  ;;  %v2441_v45 = vld [vmem:[%s3039_s23 + $0x8] sm:$0xff]  }
 0x547   : > { %2251 = vmatmul.mubr.msk.bf16.vlgmr.msra.gmra.mrb[12].mxu0 %vm1021_vm9, %v1287_v42 }
 0x548   : > { %2261 = vmatpush3.bf16.msra.mxu0 %v1410_v44  ;;  %2262 = vmatprep.mubr.msk.bf16.mxu0 %vm2693_vm4, %v2692_v34  ;;  %v1408_v49 = vpack.c.bf16 %v1407_v47, %v1406_v46 }
 0x549   : > { %2274 = vmatprep.subr.bf16.mxu0 %v2692_v34 }
 0x54f   : > { %2263 = vmatmul.mubr.msk.bf16.vlgmr.msra.gmra.mrb[16].mxu0 %vm1021_vm9, %v1408_v49 }
 0x550   : > { %2278 = vmatprep.mubr.msk.bf16.mxu0 %vm2693_vm4, %v2692_v34 }
 0x5dd   : > { %v1085_v50 = vpop.f32.mrb[4].mxu0 }
 0x5de   : > { %v2228_v51 = vpop.f32.mrb[5].mxu0 }
 0x5df   : > { %v1088_v52 = vpop.f32.mrb[6].mxu0 }
 0x5e0   : > { %v2229_v53 = vpop.f32.mrb[7].mxu0 }
 0x612   : > { %v1207_v54 = vpop.f32.mrb[8].mxu0 }
 0x613   : > { %v2240_v55 = vpop.f32.mrb[9].mxu0 }
 0x614   : > { %v1210_v56 = vpop.f32.mrb[10].mxu0 }
 0x615   : > { %v2421_v58 = vpack.i.bf16 %v1210_v56, %v1207_v54  ;;  %v2241_v59 = vpop.f32.mrb[11].mxu0 }
 0x616   : > { %v2145_v59 = vld [vmem:[%s3408_s10] ss:$0 sm:$0xff] }
 0x617   : > { %2422 = vrot.lane.b32.xlu1 %v2421_v58, %s2705_s30 }
 0x61a   : > { %v1328_v60 = vpop.f32.mrb[12].mxu0 }
 0x61b   : > { %v2252_v61 = vpop.f32.mrb[13].mxu0 }
 0x61c   : > { %v1331_v63 = vpop.f32.mrb[14].mxu0 }
 0x61d   : > { %v2426_v0 = vpack.i.bf16 %v1331_v63, %v1328_v60  ;;  %v2253_v1 = vpop.f32.mrb[15].mxu0 }
 0x61e   : > { %v2443_v1 = vld [vmem:[%s3049_s13 + $0x8] sm:$0xff]  }
 0x61f   : > { %2427 = vrot.lane.b32.xlu0 %v2426_v0, %s2706_s3  ;;  %v2442_v0 = vld [vmem:[%s3049_s13] sm:$0xff]  }
 0x622   : > { %v1449_v2 = vpop.f32.mrb[16].mxu0 }
 0x623   : > { %v2264_v3 = vpop.f32.mrb[17].mxu0 }
 0x624   : > { %v1452_v4 = vpop.f32.mrb[18].mxu0  ;;  %v2445_v3 = vld [vmem:[%s3049_s13 + $0x18] sm:$0xff]  }
 0x625   : > { %v2431_v5 = vpack.i.bf16 %v1452_v4, %v1449_v2  ;;  %v2265_v6 = vpop.f32.mrb[19].mxu0  ;;  %v2444_v2 = vld [vmem:[%s3049_s13 + $0x10] sm:$0xff]   ;;  %v2146_v4 = vld [vmem:[%s753_s22] ss:$0 sm:$0xff] }
 0x627   : > { %2432 = vrot.lane.b32.xlu1 %v2431_v5, %s2707_s6 }
 0x689   : > { %v2423_v7 = vpop.permute.xlu1 %2422 }
 0x68a   : > { %v2425_v9 = vunpack.i.h.bf16 %v2423_v7  ;;  %v2424_v10 = vunpack.i.l.bf16 %v2423_v7 }
 0x68c   : > { %v1481_v14 = vsel %vm973_vm6, %v1088_v52, %v2425_v9  ;;  %v1480_v15 = vsel %vm973_vm6, %v1085_v50, %v2424_v10 }
 0x691   : > { %v2428_v8 = vpop.permute.xlu0 %2427 }
 0x692   : > { %v2430_v11 = vunpack.i.h.bf16 %v2428_v8  ;;  %v2429_v12 = vunpack.i.l.bf16 %v2428_v8 }
 0x694   : > { %v1483_v18 = vsel %vm1021_vm9, %v1481_v14, %v2430_v11  ;;  %v1482_v19 = vsel %vm1021_vm9, %v1480_v15, %v2429_v12 }
 0x699   : > { %v2433_v13 = vpop.permute.xlu1 %2432 }
 0x69a   : > { %v2435_v16 = vunpack.i.h.bf16 %v2433_v13  ;;  %v2434_v17 = vunpack.i.l.bf16 %v2433_v13 }
 0x69c   : > { %v1486_v20 = vsel %vm1484_vm10, %v1483_v18, %v2435_v16  ;;  %v1485_v21 = vsel %vm1484_vm10, %v1482_v19, %v2434_v17 }
 0x69d   : > { %v1487_v22 = vpack.c.bf16 %v1486_v20, %v1485_v21 }
 0x69f   : > { %2271 = vmatmul.mubr.msk.bf16.vlgmr.msra.gmra.mrb[16].mxu1 %vm912_vm5, %v1487_v22 }
 0x6a0   : > { %2290 = vmatprep.mubr.msk.bf16.mxu1 %vm2693_vm4, %v2692_v34  ;;  %2283 = vmatpush3.bf16.msra.mxu1 %v2442_v0 }
 0x6a1   : > { %2284 = vmatprep.subr.bf16.mxu1 %v2692_v34 }
 0x6a4   : > { %2285 = vmatpush3.bf16.msra.mxu1 %v2443_v1  ;;  %v2150_v1 = vld [vmem:[%s761_s0] ss:$0 sm:$0xff] }
 0x6a5   : > { %2286 = vmatprep.subr.bf16.mxu1 %v2692_v34 }
 0x6a8   : > { %2287 = vmatpush3.bf16.msra.mxu1 %v2444_v2 }
 0x6a9   : > { %2288 = vmatprep.subr.bf16.mxu1 %v2692_v34 }
 0x6ac   : > { %2289 = vmatpush3.bf16.msra.mxu1 %v2445_v3 }
 0x772   : > { %v1548_v24 = vpop.f32.mrb[16].mxu1 }
 0x773   : > { %v1549_v48 = vadd.f32 %v2140_v23, %v1548_v24  ;;  %v2272_v25 = vpop.f32.mrb[17].mxu1 }
 0x774   : > { %v1551_v26 = vpop.f32.mrb[18].mxu1 }
 0x775   : > { %v1552_v27 = vadd.f32 %v2140_v23, %v1551_v26  ;;  %v2273_v28 = vpop.f32.mrb[19].mxu1  ;;  %v1555_v29 = vadd.f32 %v1549_v48, %v3078_v36 }
 0x777   : > { %v1559_v30 = vsel %vm912_vm5, %v1555_v29, 0.0  ;;  %v1556_v31 = vadd.f32 %v1552_v27, %v3080_v37  ;;  %v2440_v37 = vld [vmem:[%s3039_s23] sm:$0xff]   ;;  %s3406_s23 = scalar_lea.vmem %s3322_s8, %s3007_s20 }
 0x778   : > { %1560 = vadd.xlane.f32.xlu0 %v1559_v30  ;;  %2275 = vmatpush3.bf16.msra.mxu0 %v2440_v37  ;;  %v2144_v55 = vld [vmem:[%s3406_s23] ss:$0 sm:$0xff] }
 0x779   : > { %v1562_v32 = vsel %vm912_vm5, %v1556_v31, 0.0  ;;  %2276 = vmatprep.subr.bf16.mxu0 %v2692_v34 }
 0x77a   : > { %1563 = vadd.xlane.f32.xlu1 %v1562_v32 }
 0x77c   : > { %2277 = vmatpush3.bf16.msra.mxu0 %v2441_v45 }
 0x805   : > { %v1561_v33 = vpop.xlane.xlu0 %1560 }
 0x806   : > { %v1566_v35 = vmul.f32 0.03125, %v1561_v33 }
 0x807   : > { %v1564_v38 = vpop.xlane.xlu1 %1563 }
 0x808   : > { %v1568_v39 = vsub.f32 %v1555_v29, %v1566_v35  ;;  %v1567_v40 = vmul.f32 0.03125, %v1564_v38 }
 0x80a   : > { %v1569_v41 = vsub.f32 %v1556_v31, %v1567_v40  ;;  %v1570_v42 = vmul.f32 %v1568_v39, %v1568_v39 }
 0x80c   : > { %v1572_v43 = vsel %vm912_vm5, %v1570_v42, 0.0  ;;  %v1571_v36 = vmul.f32 %v1569_v41, %v1569_v41 }
 0x80d   : > { %1573 = vadd.xlane.f32.xlu0 %v1572_v43 }
 0x80e   : > { %v1575_v44 = vsel %vm912_vm5, %v1571_v36, 0.0 }
 0x811   : > { %1576 = vadd.xlane.f32.xlu0 %v1575_v44 }
 0x89a   : > { %v1574_v46 = vpop.xlane.xlu0 %1573 }
 0x89b   : > { %v1578_v47 = vmul.f32 0.03125, %v1574_v46 }
 0x89d   : > { %v1580_v49 = vadd.f32 1e-05, %v1578_v47 }
 0x89e   : > { %v1577_v50 = vpop.xlane.xlu0 %1576 }
 0x89f   : > { %2478 = vrsqrt.f32 %v1580_v49  ;;  %v1579_v51 = vmul.f32 0.03125, %v1577_v50  ;;  %v2708_v49 = vmov -1.0  }
 0x8a1   : > { %v1581_v52 = vadd.f32 1e-05, %v1579_v51 }
 0x8a3   : > { %2480 = vrsqrt.f32 %v1581_v52 }
 0x8a9   : > { %v2479_v53 = vpop.eup %2478 }
 0x8aa   : > { %v1584_v54 = vmul.f32 %v2479_v53, %v1568_v39 }
 0x8ac   : > { %v1592_v57 = vmul.f32 %v2144_v55, %v1584_v54 }
 0x8ad   : > { %v2481_v56 = vpop.eup %2480 }
 0x8ae   : > { %v1585_v58 = vmul.f32 %v2481_v56, %v1569_v41  ;;  %v3204_v61 = vadd.f32 %v2145_v59, %v1592_v57 }
 0x8b0   : > { %v1593_v60 = vmul.f32 %v2144_v55, %v1585_v58 }
 0x8b2   : > { %v3206_v62 = vadd.f32 %v2145_v59, %v1593_v60 }
 0x8b4   : > { %v1602_v63 = vpack.c.bf16 %v3206_v62, %v3204_v61 }
 0x8b6   : > { %2279 = vmatmul.mubr.msk.bf16.vlgmr.msra.gmra.mrb[20].mxu0 %vm912_vm5, %v1602_v63 }
 0x989   : > { %v1663_v5 = vpop.f32.mrb[20].mxu0 }
 0x98a   : > { %v1664_v6 = vadd.f32 %v2146_v4, %v1663_v5  ;;  %v2280_v7 = vpop.f32.mrb[21].mxu0 }
 0x98b   : > { %v1666_v8 = vpop.f32.mrb[22].mxu0 }
 0x98c   : > { %v1672_v9 = vmul.f32 0.70710677, %v1664_v6  ;;  %v1667_v10 = vadd.f32 %v2146_v4, %v1666_v8  ;;  %v2281_v11 = vpop.f32.mrb[23].mxu0  ;;  %v1670_v57 = vmul.f32 0.5, %v1664_v6 }
 0x98e   : > { %v1678_v12 = vand.u32 2147483647, %v1672_v9  ;;  %v1673_v13 = vmul.f32 0.70710677, %v1667_v10  ;;  %vm1674_vm11 = vcmp.ge.f32.partialorder %v1672_v9, 0.0  ;;  %v1671_v58 = vmul.f32 0.5, %v1667_v10 }
 0x98f   : > { %v1676_v50 = vsel %vm1674_vm11, 1.0, %v2708_v49 }
 0x990   : > { %v1680_v14 = vmul.f32 0.3275911, %v1678_v12  ;;  %v1679_v15 = vand.u32 2147483647, %v1673_v13  ;;  %v1706_v18 = vsub.f32 0.0, %v1678_v12  ;;  %vm1675_vm12 = vcmp.ge.f32.partialorder %v1673_v13, 0.0 }
 0x991   : > { %v1677_v54 = vsel %vm1675_vm12, 1.0, %v2708_v49 }
 0x992   : > { %v1682_v16 = vadd.f32 1.0, %v1680_v14  ;;  %v1681_v34 = vmul.f32 0.3275911, %v1679_v15  ;;  %v1707_v19 = vsub.f32 0.0, %v1679_v15  ;;  %v1708_v21 = vmul.f32 %v1706_v18, %v1678_v12 }
 0x994   : > { %2482 = vrcp.f32 %v1682_v16  ;;  %v1683_v17 = vadd.f32 1.0, %v1681_v34  ;;  %v1709_v48 = vmul.f32 %v1707_v19, %v1679_v15  ;;  %v1710_v25 = vmul.f32 1.442695, %v1708_v21 }
 0x996   : > { %2484 = vrcp.f32 %v1683_v17  ;;  %v1712_v30 = vmul.f32 1.442695, %v1709_v48 }
 0x997   : > { %2486 = vpow2.f32 %v1710_v25  ;;  %v2156_v25 = vld [vmem:[%s764_s29] ss:$0 sm:$0xff] }
 0x998   : > { %2488 = vpow2.f32 %v1712_v30 }
 0x99e   : > { %v2483_v20 = vpop.eup %2482 }
 0x99f   : > { %v1688_v22 = vmul.f32 1.0614054, %v2483_v20 }
 0x9a0   : > { %v2485_v23 = vpop.eup %2484 }
 0x9a1   : > { %v1690_v24 = vadd.f32 -1.4531521, %v1688_v22  ;;  %v1689_v26 = vmul.f32 1.0614054, %v2485_v23  ;;  %v2487_v36 = vpop.eup %2486 }
 0x9a2   : > { %v2489_v46 = vpop.eup %2488 }
 0x9a3   : > { %v1692_v27 = vmul.f32 %v2483_v20, %v1690_v24  ;;  %v1691_v28 = vadd.f32 -1.4531521, %v1689_v26 }
 0x9a5   : > { %v1694_v29 = vadd.f32 1.4214138, %v1692_v27  ;;  %v1693_v31 = vmul.f32 %v2485_v23, %v1691_v28  ;;  %v2157_v28 = vld [vmem:[%s767_s15] ss:$0 sm:$0xff] }
 0x9a7   : > { %v1696_v32 = vmul.f32 %v2483_v20, %v1694_v29  ;;  %v1695_v33 = vadd.f32 1.4214138, %v1693_v31 }
 0x9a9   : > { %v1698_v35 = vadd.f32 -0.28449672, %v1696_v32  ;;  %v1697_v38 = vmul.f32 %v2485_v23, %v1695_v33 }
 0x9ab   : > { %v1700_v39 = vmul.f32 %v2483_v20, %v1698_v35  ;;  %v1699_v40 = vadd.f32 -0.28449672, %v1697_v38 }
 0x9ad   : > { %v1702_v41 = vadd.f32 0.2548296, %v1700_v39  ;;  %v1701_v42 = vmul.f32 %v2485_v23, %v1699_v40 }
 0x9af   : > { %v1704_v43 = vmul.f32 %v2483_v20, %v1702_v41  ;;  %v1703_v44 = vadd.f32 0.2548296, %v1701_v42 }
 0x9b1   : > { %v1714_v37 = vmul.f32 %v2487_v36, %v1704_v43  ;;  %v1705_v45 = vmul.f32 %v2485_v23, %v1703_v44 }
 0x9b3   : > { %v1716_v47 = vsub.f32 1.0, %v1714_v37  ;;  %v1715_v51 = vmul.f32 %v2489_v46, %v1705_v45 }
 0x9b5   : > { %v1718_v52 = vmul.f32 %v1716_v47, %v1676_v50  ;;  %v1717_v53 = vsub.f32 1.0, %v1715_v51 }
 0x9b7   : > { %v1720_v55 = vadd.f32 1.0, %v1718_v52  ;;  %v1719_v56 = vmul.f32 %v1717_v53, %v1677_v54 }
 0x9b9   : > { %v1721_v59 = vadd.f32 1.0, %v1719_v56  ;;  %v1722_v60 = vmul.f32 %v1720_v55, %v1670_v57 }
 0x9bb   : > { %v1723_v63 = vmul.f32 %v1721_v59, %v1671_v58 }
 0x9bd   : > { %v1724_v0 = vpack.c.bf16 %v1723_v63, %v1722_v60 }
 0x9bf   : > { %2291 = vmatmul.mubr.msk.bf16.vlgmr.msra.gmra.mrb[20].mxu1 %vm1764_vm13, %v1724_v0 }
 0xa92   : > { %v1802_v2 = vpop.f32.mrb[20].mxu1 }
 0xa93   : > { %v1803_v3 = vadd.f32 %v2150_v1, %v1802_v2  ;;  %v2292_v4 = vpop.f32.mrb[21].mxu1 }
 0xa94   : > { %v1805_v5 = vpop.f32.mrb[22].mxu1 }
 0xa95   : > { %v1806_v7 = vadd.f32 %v2150_v1, %v1805_v5  ;;  %v2293_v8 = vpop.f32.mrb[23].mxu1  ;;  %v1809_v6 = vadd.f32 %v1803_v3, %v3204_v61 }
 0xa97   : > { %v1813_v9 = vsel %vm912_vm5, %v1809_v6, 0.0  ;;  %v1810_v10 = vadd.f32 %v1806_v7, %v3206_v62 }
 0xa98   : > { %1814 = vadd.xlane.f32.xlu1 %v1813_v9 }
 0xa99   : > { %v1816_v11 = vsel %vm912_vm5, %v1810_v10, 0.0 }
 0xa9a   : > { %1817 = vadd.xlane.f32.xlu0 %v1816_v11 }
 0xb25   : > { %v1815_v12 = vpop.xlane.xlu1 %1814 }
 0xb26   : > { %v1819_v13 = vmul.f32 0.03125, %v1815_v12 }
 0xb27   : > { %v1818_v14 = vpop.xlane.xlu0 %1817 }
 0xb28   : > { %v1821_v15 = vsub.f32 %v1809_v6, %v1819_v13  ;;  %v1820_v16 = vmul.f32 0.03125, %v1818_v14 }
 0xb2a   : > { %v1822_v34 = vsub.f32 %v1810_v10, %v1820_v16  ;;  %v1823_v17 = vmul.f32 %v1821_v15, %v1821_v15 }
 0xb2c   : > { %v1825_v18 = vsel %vm912_vm5, %v1823_v17, 0.0  ;;  %v1824_v19 = vmul.f32 %v1822_v34, %v1822_v34 }
 0xb2d   : > { %1826 = vadd.xlane.f32.xlu1 %v1825_v18 }
 0xb2e   : > { %v1828_v61 = vsel %vm912_vm5, %v1824_v19, 0.0 }
 0xb2f   : > { %1829 = vadd.xlane.f32.xlu0 %v1828_v61 }
 0xbba   : > { %v1827_v62 = vpop.xlane.xlu1 %1826 }
 0xbbb   : > { %v1831_v20 = vmul.f32 0.03125, %v1827_v62 }
 0xbbc   : > { %v1830_v21 = vpop.xlane.xlu0 %1829 }
 0xbbd   : > { %v1833_v22 = vadd.f32 1e-05, %v1831_v20  ;;  %v1832_v23 = vmul.f32 0.03125, %v1830_v21 }
 0xbbf   : > { %2490 = vrsqrt.f32 %v1833_v22  ;;  %v1834_v24 = vadd.f32 1e-05, %v1832_v23 }
 0xbc1   : > { %2492 = vrsqrt.f32 %v1834_v24 }
 0xbc9   : > { %v2491_v48 = vpop.eup %2490 }
 0xbca   : > { %v1837_v26 = vmul.f32 %v2491_v48, %v1821_v15  ;;  %1858 = sbr.rel (%p2158_p10) target bundleno = 3027 (0xbd3), region = 104 }
 0xbcb   : > { %v2493_v27 = vpop.eup %2492 }
 0xbcc   : > { %v1845_v29 = vmul.f32 %v2156_v25, %v1837_v26  ;;  %v1838_v30 = vmul.f32 %v2493_v27, %v1822_v34 }
 0xbce   : > { %v1853_v31 = vadd.f32 %v2157_v28, %v1845_v29  ;;  %v1846_v32 = vmul.f32 %v2156_v25, %v1838_v30 }
 0xbd0   : > { %v1854_v33 = vadd.f32 %v2157_v28, %v1846_v32  ;;  %1859 = vst.msk [vmem:[#allocation2] sm:$0xff] (!%p2158_p10), %vm912_vm5, %v1853_v31 }
 0xbd2   : > { %1860 = vst.msk [vmem:[#allocation2 + $0x8] sm:$0xff] %vm912_vm5, %v1854_v33 }
 0xbd3 PF: > { %p2159_p8 = scmp.ne.s32.totalorder %s2666_s24, 1 }
 0xbd4   : > { %1865 = vst.msk [vmem:[%s3063_s12] sm:$0xff] (!%p2159_p8), %vm912_vm5, %v1853_v31  ;;  %1866 = vst.msk [vmem:[%s3063_s12 + $0x8] sm:$0xff] (!%p2159_p8), %vm912_vm5, %v1854_v33 }
 0xbd5   : > { %1864 = sbr.rel (%p2159_p8) target bundleno = 3036 (0xbdc), region = 108 }
 0xbdc PF: > { %s3413_s15 = sld [smem:[#allocation16_spill]]  ;;  %s3414_s20 = sld [smem:[#allocation25_spill]] }
 0xbdd   : > { %s3416_s14 = sld [smem:[#allocation39_spill]]  ;;  %s1881_s23 = sshll.u32 %s3063_s12, 4  ;;  %s3259_s23 = int_to_ptr.vmem [resolvable:$true] %s1881_s23 }
 0xbde   : > { %s2580_s1 = scalar_lea.vmem %s3259_s23, 256  ;;  %s2709_s19 = smov [#allocation9]  }
 0xbdf   : > { %p2581_p13 = scmp.ne.s32.totalorder %s3259_s23, %s2580_s1  ;;  %s2584_s25 = sshll.u32 %s2709_s19, 4  ;;  %s2585_s25 = int_to_ptr.vmem [resolvable:$false] %s2584_s25 }
 0xbe0   : > { %s2586_s10 = scalar_lea.vmem %s2585_s25, 512  ;;  %p2587_p12 = scmp.lt.s32.totalorder %s3259_s23, %s2585_s25 }
 0xbe1   : > { %p2582_p3 = pnand %p2581_p13, %p2937_p6  ;;  %p2588_p11 = scmp.lt.s32.totalorder %s2586_s10, %s2580_s1 }
 0xbe2   : > { %s2169_s16 = sshll.u32 %s3413_s15, 8  ;;  %s1868_s24 = scalar_lea.sflag [#allocation5], %s3414_s20 }
 0xbe3   : > { %s3256_s17 = scalar_lea.hbm %s3416_s14, %s2169_s16  ;;  %p2583_p7 = pneg %p2582_p3 }
 0xbe4   : > { %p2589_p1 = por %p2588_p11, %p2587_p12 }
 0xbe6   : > { %p2590_p9 = pnand %p2589_p1, %p2583_p7 }
 0xbe8   : > { %2593 = shalt.err (!%p2590_p9)
}
 0xbe9   : > { %s2594_s12 = scalar_lea.hbm %s3256_s17, 256  ;;  %s2598_s2 = scalar_lea.hbm %s3416_s14, 512 }
 0xbea   : > { %p2595_p5 = scmp.ne.s32.totalorder %s3256_s17, %s2594_s12  ;;  %p2599_p4 = scmp.lt.u32.totalorder %s3256_s17, %s3416_s14 }
 0xbeb   : > { %p2600_p10 = scmp.lt.u32.totalorder %s2598_s2, %s2594_s12  ;;  %p2602_p13 = scmp.lt.u32.totalorder %s2594_s12, %s3256_s17 }
 0xbec   : > { %p2596_p2 = pnand %p2595_p5, %p2937_p6 }
 0xbed   : > { %p2601_p8 = por %p2600_p10, %p2599_p4 }
 0xbee   : > { %p2597_p0 = pneg %p2596_p2 }
 0xbef   : > { %p2603_p3 = por %p2602_p13, %p2601_p8 }
 0xbf1   : > { %p2604_p7 = pnand %p2603_p3, %p2597_p0 }
 0xbf3   : > { %2607 = shalt.err (!%p2604_p7)
}
 0xbf4   : > { %s2710_s11 = smov 128  }
 0xbf5   : > { %2307 = dma.vmem_to_hbm [thread:$0]  (%p2937_p6), %s3259_s23, 256, %s3256_s17, %s1868_s24, %s2710_s11, %s2710_s11, %s2705_s30  }
 0xbf6 PF: > { %s3417_s0 = sld [smem:[#allocation19_spill]]  ;;  %s3418_s9 = sld [smem:[#allocation13_spill]] }
 0xbf7   : > { %s3419_s4 = sld [smem:[#allocation20_spill]] }
 0xbfc   : > { %p2329_p12 = scmp.ge.s32.totalorder %s3417_s0, 2  ;;  %s1896_s18 = sand.u32 1, %s3418_s9  }
 0xbfd   : > { %p3420_p11 = scmp.ne.s32.totalorder %s3419_s4, 0  ;;  %s1897_s3 = scalar_lea.sflag [#allocation5], %s1896_s18 }
 0xbff   : > { %p2321_p1 = pnand %p2329_p12, %p3420_p11 }
 0xc01   : > { %2649 = dma.done.wait (!%p2321_p1), %s1897_s3, 256  }
 0xc02   : > { %2651 = vsyncadd (!%p2321_p1), %s1897_s3, 4294967040  ;;  %s33_s28 = sadd.s32 1, %s3417_s0   ;;  %s3421_s21 = sld [smem:[#allocation14_spill]] }
 0xc03   : > { %p30_p9 = scmp.ge.s32.totalorder %s33_s28, 6   ;;  %s3422_s22 = sld [smem:[#allocation15_spill]] }
 0xc04   : > { %s3423_s23 = sld [smem:[#allocation24_spill]]  ;;  %s3424_s24 = sld [smem:[#allocation17_spill]] }
 0xc05   : > { %s3425_s25 = sld [smem:[#allocation18_spill]]  ;;  %s3426_s26 = sld [smem:[#allocation21_spill]] }
 0xc06   : > { %s3427_s27 = sld [smem:[#allocation23_spill]]  ;;  %32 = sbr.rel (!%p30_p9) target bundleno = 23 (0x17), region = 185 }
 0xc0d   :  { %1902 = vsyncpa [#allocation4], 1 }
 0xc0e   :  { %1904 = vsyncpa [#allocation4 + $0x1], 1 }
 0xc0f   :  { %1905 = vsyncpa [#allocation7], 1 }
 0xc10   :  { %1906 = vsyncpa [#allocation5], 1 }
 0xc11   :  { %1908 = vsyncpa [#allocation5 + $0x1], 1 }

</bundles_post_ra>
